<compile_context>
chip_gen: v5e
topology: v5e:2x2
jax: 0.10.0
libtpu: 0.0.40
codegen_flags: <defaults>
</compile_context>

<pallas_src>
import functools

import jax
import jax.numpy as jnp
from jax.experimental import pallas as pl
from jax.experimental.pallas import tpu as pltpu


FOURIER_DEGREE = 5
OUT_CLS = 4
OUT_REG = (2 * FOURIER_DEGREE + 1) * 2   # 22
OUT_TOTAL = OUT_CLS + OUT_REG            # 26
COUT_PAD = 32                            # 26 padded to a sublane-friendly 32
KSIZE = 3


def _round_up(x, m):
    return ((x + m - 1) // m) * m


def _sigmoid(z):
    return 1.0 / (1.0 + jnp.exp(-z))


def _vmem_budget_bytes():
    """VMEM budget derived from the device (v7x: 64 MiB, v5e/v6e: 128 MiB)."""
    cap = 64 * 1024 * 1024
    try:
        cap = int(getattr(pltpu.get_tpu_info(), "vmem_capacity_bytes", cap))
    except Exception:
        pass
    return int(min(cap * 0.70, 100 * 1024 * 1024))


def _fce_conv_kernel(x_ref, w_ref, b_ref, o_ref, acc_ref, *, wp, out_flat):
    """One grid step = one (batch, channel-chunk) of one feature level.

    x_ref:   (c_chunk, in_flat)  flattened padded feature plane, row stride wp
    w_ref:   (9, 32, c_chunk)    per-tap fused (cls+reg) weights, Cout padded
    b_ref:   (32, 1)             fused bias (padded), float32
    o_ref:   (32, out_flat)      channel-major output (spatial flat on lanes)
    acc_ref: (32, out_flat)      float32 accumulator, resident across k steps
    """
    k = pl.program_id(1)
    nk = pl.num_programs(1)

    # 3x3 conv = 9 channel-major matmuls; each tap's operand is a contiguous
    # lane slice of the flat plane at offset kh*wp + kw.  The first tap of the
    # first channel chunk initializes the accumulator (no zero / bias pass);
    # all other taps accumulate in place (MRB on v7x).
    tap0 = jnp.dot(w_ref[0], x_ref[:, 0:out_flat],
                   preferred_element_type=jnp.float32)

    @pl.when(k == 0)
    def _():
        acc_ref[...] = tap0

    @pl.when(k > 0)
    def _():
        acc_ref[...] += tap0

    for tap in range(1, KSIZE * KSIZE):
        kh, kw = divmod(tap, KSIZE)
        s = kh * wp + kw
        acc_ref[...] += jnp.dot(w_ref[tap], x_ref[:, s:s + out_flat],
                                preferred_element_type=jnp.float32)

    # Finalize on the last channel chunk: add the bias once, then the two
    # 2-way softmaxes as a single sigmoid each (p = sigmoid(a-b), 1-p) — no
    # cross-lane reductions, no concatenate; only 4 one-row re-stores.
    @pl.when(k == nk - 1)
    def _():
        res = acc_ref[...] + b_ref[...]
        s01 = _sigmoid(res[0:1, :] - res[1:2, :])
        s23 = _sigmoid(res[2:3, :] - res[3:4, :])
        o_ref[...] = res
        o_ref[0:1, :] = s01
        o_ref[1:2, :] = 1.0 - s01
        o_ref[2:3, :] = s23
        o_ref[3:4, :] = 1.0 - s23


def _plan_level(n, c, h, w, esize, budget):
    """Static geometry for one feature level, sized from the VMEM budget."""
    wp = w + 2
    out_flat = _round_up(h * wp, 128)          # lane-dense output width
    need = out_flat + 2 * wp + 2               # max tap-slice end
    hrows = max(h + 2, -(-need // wp))         # padded rows (incl. 1-row halo)
    in_flat = hrows * wp

    # Per-step VMEM: double-buffered X + weight blocks scale with c_chunk;
    # the resident out block (x2 buffers) and the f32 accumulator are fixed.
    fixed = 3 * COUT_PAD * out_flat * 4 + 64 * 1024
    per_ch = 2 * in_flat * esize + 2 * KSIZE * KSIZE * COUT_PAD * esize
    cap = max(8, (budget - fixed) // per_ch)

    if c <= cap:
        c_chunk = c
    else:
        c_chunk = 0
        for d in range(8, int(cap) + 1, 8):    # multiple of 8 (sublane rule)
            if c % d == 0:
                c_chunk = d
        if c_chunk == 0:
            c_chunk = c                        # fallback for odd channel counts
    return c_chunk, out_flat, hrows


@functools.partial(
    jax.jit,
    static_argnames=("c_chunk", "out_flat", "hrows", "compute_dtype",
                     "vmem_limit"))
def _fce_level_forward(x_nchw, w_taps, b_mat, *, c_chunk, out_flat, hrows,
                       compute_dtype, vmem_limit):
    n, c, h, w = x_nchw.shape
    wp = w + 2
    in_flat = hrows * wp
    kc = c // c_chunk

    # One fused pad: cast to the MXU compute dtype, add the 1px conv halo and
    # enough bottom rows that every tap slice of length out_flat stays in
    # bounds; the spatial flatten is a free view.
    xpad = jnp.pad(x_nchw.astype(compute_dtype),
                   ((0, 0), (0, 0), (1, hrows - h - 1), (1, 1)))
    x_flat = xpad.reshape(n, c, in_flat)

    # (9, 32, C) -> (kc, 9, 32, c_chunk): channel chunks on a leading dim so
    # the weight block keeps full minor dims.  Tiny; done at trace time.
    w_split = jnp.transpose(
        w_taps.reshape(KSIZE * KSIZE, COUT_PAD, kc, c_chunk),
        (2, 0, 1, 3)).astype(compute_dtype)

    kernel = functools.partial(_fce_conv_kernel, wp=wp, out_flat=out_flat)

    esize = jnp.dtype(compute_dtype).itemsize
    cost = pl.CostEstimate(
        flops=2 * KSIZE * KSIZE * c * COUT_PAD * n * out_flat,
        transcendentals=2 * n * out_flat,
        bytes_accessed=int(n * c * in_flat * esize
                           + w_split.size * esize
                           + b_mat.size * 4
                           + n * COUT_PAD * out_flat * 4))

    out = pl.pallas_call(
        kernel,
        out_shape=jax.ShapeDtypeStruct((n, COUT_PAD, out_flat), jnp.float32),
        grid=(n, kc),
        in_specs=[
            pl.BlockSpec((None, c_chunk, in_flat), lambda b, k: (b, k, 0)),
            pl.BlockSpec((None, KSIZE * KSIZE, COUT_PAD, c_chunk),
                         lambda b, k: (k, 0, 0, 0)),
            pl.BlockSpec((COUT_PAD, 1), lambda b, k: (0, 0)),
        ],
        out_specs=pl.BlockSpec((None, COUT_PAD, out_flat),
                               lambda b, k: (b, 0, 0)),
        scratch_shapes=[pltpu.VMEM((COUT_PAD, out_flat), jnp.float32)],
        compiler_params=pltpu.CompilerParams(
            dimension_semantics=("parallel", "arbitrary"),
            vmem_limit_bytes=int(vmem_limit)),
        cost_estimate=cost,
    )(x_flat, w_split, b_mat)

    # (N, 32, out_flat) -> (N, 26, H, W): drop channel/spatial padding and the
    # 2 wrap-around halo columns of each flattened row.  Slice + view reshape
    # only — no transpose / extra HBM round trip of the output.
    out = out[:, :OUT_TOTAL, :h * wp].reshape(n, OUT_TOTAL, h, wp)
    return out[:, :, :, :w]


class FCEHeadPallas:
    """JAX/Pallas re-implementation of FCEHead (inference / eval mode)."""

    def __init__(self, in_channels, fourier_degree=5, key=None,
                 compute_dtype=jnp.float32):
        assert fourier_degree == FOURIER_DEGREE
        self.in_channels = in_channels
        self.compute_dtype = compute_dtype
        self.vmem_budget = _vmem_budget_bytes()
        if key is None:
            key = jax.random.PRNGKey(0)
        k1, k2, k3, k4 = jax.random.split(key, 4)
        # PyTorch conv weights are OIHW; deterministic synthetic init.
        self.w_cls = 0.1 * jax.random.normal(
            k1, (OUT_CLS, in_channels, KSIZE, KSIZE), jnp.float32)
        self.b_cls = 0.1 * jax.random.normal(k2, (OUT_CLS,), jnp.float32)
        self.w_reg = 0.1 * jax.random.normal(
            k3, (OUT_REG, in_channels, KSIZE, KSIZE), jnp.float32)
        self.b_reg = 0.1 * jax.random.normal(k4, (OUT_REG,), jnp.float32)

        # Fuse cls+reg convs; per-tap layout (9, Cout_pad, Cin) so the kernel
        # does a channel-major (Cout x Cin) @ (Cin x HW) matmul per tap.
        w_all = jnp.concatenate([self.w_cls, self.w_reg], axis=0)   # (26,C,3,3)
        w_taps = jnp.transpose(w_all, (2, 3, 0, 1)).reshape(
            KSIZE * KSIZE, OUT_TOTAL, in_channels)                  # (9,26,C)
        self.w_taps = jnp.pad(
            w_taps, ((0, 0), (0, COUT_PAD - OUT_TOTAL), (0, 0)))    # (9,32,C)
        b_all = jnp.concatenate([self.b_cls, self.b_reg])           # (26,)
        self.b_mat = jnp.pad(
            b_all, (0, COUT_PAD - OUT_TOTAL))[:, None]              # (32,1)

    def __call__(self, feats):
        """feats: list of NCHW float32 feature maps. Returns eval-mode dict."""
        esize = jnp.dtype(self.compute_dtype).itemsize
        outs = {}
        for i, x_nchw in enumerate(feats):
            n, c, h, w = x_nchw.shape
            assert c == self.in_channels
            c_chunk, out_flat, hrows = _plan_level(
                n, c, h, w, esize, self.vmem_budget)
            outs["level_{}".format(i)] = _fce_level_forward(
                x_nchw, self.w_taps, self.b_mat,
                c_chunk=c_chunk, out_flat=out_flat, hrows=hrows,
                compute_dtype=self.compute_dtype,
                vmem_limit=self.vmem_budget)
        return outs


def _reference_level(x_nchw, w_cls, b_cls, w_reg, b_reg):
    """Pure-JAX reference of FCEHead.forward_single + eval post-processing."""
    def conv(x, wgt, b):
        y = jax.lax.conv_general_dilated(
            x, wgt, window_strides=(1, 1), padding="SAME",
            dimension_numbers=("NCHW", "OIHW", "NCHW"))
        return y + b[None, :, None, None]

    cls_res = conv(x_nchw, w_cls, b_cls)
    reg_res = conv(x_nchw, w_reg, b_reg)
    tr = jax.nn.softmax(cls_res[:, 0:2], axis=1)
    tcl = jax.nn.softmax(cls_res[:, 2:4], axis=1)
    return jnp.concatenate([tr, tcl, reg_res], axis=1)


if __name__ == "__main__":
    key = jax.random.PRNGKey(0)
    k_feat0, k_feat1, k_params = jax.random.split(key, 3)

    in_channels = 4
    # Two FPN-style feature levels (NCHW, matching PyTorch conv input layout).
    feats = [
        jax.random.normal(k_feat0, (2, in_channels, 16, 16), jnp.float32),
        jax.random.normal(k_feat1, (2, in_channels, 8, 8), jnp.float32),
    ]

    # f32 MXU path: strict parity with the PyTorch-equivalent reference.
    head = FCEHeadPallas(in_channels, fourier_degree=5, key=k_params,
                         compute_dtype=jnp.float32)
    outs = head(feats)
    outs = jax.tree_util.tree_map(jax.block_until_ready, outs)

    for i, x in enumerate(feats):
        ref = _reference_level(x, head.w_cls, head.b_cls,
                               head.w_reg, head.b_reg)
        got = outs["level_{}".format(i)]
        assert got.shape == (x.shape[0], OUT_TOTAL, x.shape[2], x.shape[3])
        assert jnp.allclose(got, ref, atol=1e-4, rtol=1e-4), (
            "f32 mismatch at level {}".format(i))

    # bf16 MXU path (per perf review: halves HBM read bytes, native MXU);
    # validated against the same reference with a deliberately looser bound.
    head_bf16 = FCEHeadPallas(in_channels, fourier_degree=5, key=k_params,
                              compute_dtype=jnp.bfloat16)
    outs_bf16 = head_bf16(feats)
    outs_bf16 = jax.tree_util.tree_map(jax.block_until_ready, outs_bf16)
    for i, x in enumerate(feats):
        ref = _reference_level(x, head.w_cls, head.b_cls,
                               head.w_reg, head.b_reg)
        got = outs_bf16["level_{}".format(i)]
        assert got.shape == ref.shape
        assert jnp.allclose(got, ref, atol=5e-2, rtol=5e-2), (
            "bf16 mismatch at level {}".format(i))

    print("KERNEL_OK")
</pallas_src>

<mosaic_0001>
module attributes {stable_mosaic.version = 11 : i64} {
  func.func @_fce_conv_kernel(%arg0: i32, %arg1: i32, %arg2: memref<1x4x432xf32, #tpu.memory_space<vmem>>, %arg3: memref<1x9x32x4xf32, #tpu.memory_space<vmem>>, %arg4: memref<32x1xf32, #tpu.memory_space<vmem>>, %arg5: memref<1x32x384xf32, #tpu.memory_space<vmem>>, %arg6: memref<32x384xf32, #tpu.memory_space<vmem>>) attributes {dimension_semantics = [#tpu.dimension_semantics<parallel>, #tpu.dimension_semantics<arbitrary>], iteration_bounds = array<i64: 2, 1>, scalar_prefetch = 0 : i64, scratch_operands = 1 : i64, tpu.core_type = #tpu.core_type<tc>, window_params = [{transform_indices = @transform_0, window_bounds = array<i64: 1, 4, 432>}, {transform_indices = @transform_1, window_bounds = array<i64: 1, 9, 32, 4>}, {pipeline_mode = #tpu.pipeline_mode<synchronous>, transform_indices = @transform_2, window_bounds = array<i64: 32, 1>}, {transform_indices = @transform_3, window_bounds = array<i64: 1, 32, 384>}]} {
    %c0 = arith.constant 0 : index
    %c0_0 = arith.constant 0 : index
    %c0_1 = arith.constant 0 : index
    %c0_2 = arith.constant 0 : index
    %0 = vector.load %arg3[%c0, %c0_0, %c0_1, %c0_2] : memref<1x9x32x4xf32, #tpu.memory_space<vmem>>, vector<1x1x32x4xf32>
    %1 = vector.shape_cast %0 : vector<1x1x32x4xf32> to vector<32x4xf32>
    %c0_3 = arith.constant 0 : index
    %c0_4 = arith.constant 0 : index
    %c0_5 = arith.constant 0 : index
    %2 = vector.load %arg2[%c0_3, %c0_4, %c0_5] : memref<1x4x432xf32, #tpu.memory_space<vmem>>, vector<1x4x384xf32>
    %3 = vector.shape_cast %2 : vector<1x4x384xf32> to vector<4x384xf32>
    %cst = arith.constant dense<0.000000e+00> : vector<32x384xf32>
    %4 = tpu.matmul %1, %3, %cst {dimension_numbers = #tpu.dot_dimension_numbers<[1], [0], [0], [1], [0, 0, 1, 1], [], []>} : vector<32x4xf32>, vector<4x384xf32>, vector<32x384xf32> -> vector<32x384xf32>
    %c0_i32 = arith.constant 0 : i32
    %5 = arith.cmpi eq, %arg1, %c0_i32 : i32
    %6 = arith.extui %5 : i1 to i32
    %c0_i32_6 = arith.constant 0 : i32
    %7 = arith.cmpi ne, %6, %c0_i32_6 : i32
    scf.if %7 {
      %c0_93 = arith.constant 0 : index
      %c0_94 = arith.constant 0 : index
      %78 = vector.load %arg6[%c0_93, %c0_94] : memref<32x384xf32, #tpu.memory_space<vmem>>, vector<32x384xf32>
      tpu.vector_store %arg6[%c0_93, %c0_94], %4 {strides = array<i32>} : memref<32x384xf32, #tpu.memory_space<vmem>>, vector<32x384xf32>,
    } else {
    }
    %c0_i32_7 = arith.constant 0 : i32
    %8 = arith.cmpi sgt, %arg1, %c0_i32_7 : i32
    %9 = arith.extui %8 : i1 to i32
    %c0_i32_8 = arith.constant 0 : i32
    %10 = arith.cmpi ne, %9, %c0_i32_8 : i32
    scf.if %10 {
      %c0_93 = arith.constant 0 : index
      %c0_94 = arith.constant 0 : index
      %78 = vector.load %arg6[%c0_93, %c0_94] : memref<32x384xf32, #tpu.memory_space<vmem>>, vector<32x384xf32>
      %79 = arith.addf %78, %4 : vector<32x384xf32>
      %c0_95 = arith.constant 0 : index
      %c0_96 = arith.constant 0 : index
      %80 = vector.load %arg6[%c0_95, %c0_96] : memref<32x384xf32, #tpu.memory_space<vmem>>, vector<32x384xf32>
      tpu.vector_store %arg6[%c0_95, %c0_96], %79 {strides = array<i32>} : memref<32x384xf32, #tpu.memory_space<vmem>>, vector<32x384xf32>,
    } else {
    }
    %c0_9 = arith.constant 0 : index
    %c0_10 = arith.constant 0 : index
    %11 = vector.load %arg6[%c0_9, %c0_10] : memref<32x384xf32, #tpu.memory_space<vmem>>, vector<32x384xf32>
    %c0_11 = arith.constant 0 : index
    %c1 = arith.constant 1 : index
    %c0_12 = arith.constant 0 : index
    %c0_13 = arith.constant 0 : index
    %12 = vector.load %arg3[%c0_11, %c1, %c0_12, %c0_13] : memref<1x9x32x4xf32, #tpu.memory_space<vmem>>, vector<1x1x32x4xf32>
    %13 = vector.shape_cast %12 : vector<1x1x32x4xf32> to vector<32x4xf32>
    %c0_14 = arith.constant 0 : index
    %c0_15 = arith.constant 0 : index
    %c1_16 = arith.constant 1 : index
    %14 = vector.load %arg2[%c0_14, %c0_15, %c1_16] : memref<1x4x432xf32, #tpu.memory_space<vmem>>, vector<1x4x384xf32>
    %15 = vector.shape_cast %14 : vector<1x4x384xf32> to vector<4x384xf32>
    %cst_17 = arith.constant dense<0.000000e+00> : vector<32x384xf32>
    %16 = tpu.matmul %13, %15, %cst_17 {dimension_numbers = #tpu.dot_dimension_numbers<[1], [0], [0], [1], [0, 0, 1, 1], [], []>} : vector<32x4xf32>, vector<4x384xf32>, vector<32x384xf32> -> vector<32x384xf32>
    %17 = arith.addf %11, %16 : vector<32x384xf32>
    %c0_18 = arith.constant 0 : index
    %c0_19 = arith.constant 0 : index
    %18 = vector.load %arg6[%c0_18, %c0_19] : memref<32x384xf32, #tpu.memory_space<vmem>>, vector<32x384xf32>
    tpu.vector_store %arg6[%c0_18, %c0_19], %17 {strides = array<i32>} : memref<32x384xf32, #tpu.memory_space<vmem>>, vector<32x384xf32>,
    %c0_20 = arith.constant 0 : index
    %c0_21 = arith.constant 0 : index
    %19 = vector.load %arg6[%c0_20, %c0_21] : memref<32x384xf32, #tpu.memory_space<vmem>>, vector<32x384xf32>
    %c0_22 = arith.constant 0 : index
    %c2 = arith.constant 2 : index
    %c0_23 = arith.constant 0 : index
    %c0_24 = arith.constant 0 : index
    %20 = vector.load %arg3[%c0_22, %c2, %c0_23, %c0_24] : memref<1x9x32x4xf32, #tpu.memory_space<vmem>>, vector<1x1x32x4xf32>
    %21 = vector.shape_cast %20 : vector<1x1x32x4xf32> to vector<32x4xf32>
    %c0_25 = arith.constant 0 : index
    %c0_26 = arith.constant 0 : index
    %c2_27 = arith.constant 2 : index
    %22 = vector.load %arg2[%c0_25, %c0_26, %c2_27] : memref<1x4x432xf32, #tpu.memory_space<vmem>>, vector<1x4x384xf32>
    %23 = vector.shape_cast %22 : vector<1x4x384xf32> to vector<4x384xf32>
    %cst_28 = arith.constant dense<0.000000e+00> : vector<32x384xf32>
    %24 = tpu.matmul %21, %23, %cst_28 {dimension_numbers = #tpu.dot_dimension_numbers<[1], [0], [0], [1], [0, 0, 1, 1], [], []>} : vector<32x4xf32>, vector<4x384xf32>, vector<32x384xf32> -> vector<32x384xf32>
    %25 = arith.addf %19, %24 : vector<32x384xf32>
    %c0_29 = arith.constant 0 : index
    %c0_30 = arith.constant 0 : index
    %26 = vector.load %arg6[%c0_29, %c0_30] : memref<32x384xf32, #tpu.memory_space<vmem>>, vector<32x384xf32>
    tpu.vector_store %arg6[%c0_29, %c0_30], %25 {strides = array<i32>} : memref<32x384xf32, #tpu.memory_space<vmem>>, vector<32x384xf32>,
    %c0_31 = arith.constant 0 : index
    %c0_32 = arith.constant 0 : index
    %27 = vector.load %arg6[%c0_31, %c0_32] : memref<32x384xf32, #tpu.memory_space<vmem>>, vector<32x384xf32>
    %c0_33 = arith.constant 0 : index
    %c3 = arith.constant 3 : index
    %c0_34 = arith.constant 0 : index
    %c0_35 = arith.constant 0 : index
    %28 = vector.load %arg3[%c0_33, %c3, %c0_34, %c0_35] : memref<1x9x32x4xf32, #tpu.memory_space<vmem>>, vector<1x1x32x4xf32>
    %29 = vector.shape_cast %28 : vector<1x1x32x4xf32> to vector<32x4xf32>
    %c0_36 = arith.constant 0 : index
    %c0_37 = arith.constant 0 : index
    %c18 = arith.constant 18 : index
    %30 = vector.load %arg2[%c0_36, %c0_37, %c18] : memref<1x4x432xf32, #tpu.memory_space<vmem>>, vector<1x4x384xf32>
    %31 = vector.shape_cast %30 : vector<1x4x384xf32> to vector<4x384xf32>
    %cst_38 = arith.constant dense<0.000000e+00> : vector<32x384xf32>
    %32 = tpu.matmul %29, %31, %cst_38 {dimension_numbers = #tpu.dot_dimension_numbers<[1], [0], [0], [1], [0, 0, 1, 1], [], []>} : vector<32x4xf32>, vector<4x384xf32>, vector<32x384xf32> -> vector<32x384xf32>
    %33 = arith.addf %27, %32 : vector<32x384xf32>
    %c0_39 = arith.constant 0 : index
    %c0_40 = arith.constant 0 : index
    %34 = vector.load %arg6[%c0_39, %c0_40] : memref<32x384xf32, #tpu.memory_space<vmem>>, vector<32x384xf32>
    tpu.vector_store %arg6[%c0_39, %c0_40], %33 {strides = array<i32>} : memref<32x384xf32, #tpu.memory_space<vmem>>, vector<32x384xf32>,
    %c0_41 = arith.constant 0 : index
    %c0_42 = arith.constant 0 : index
    %35 = vector.load %arg6[%c0_41, %c0_42] : memref<32x384xf32, #tpu.memory_space<vmem>>, vector<32x384xf32>
    %c0_43 = arith.constant 0 : index
    %c4 = arith.constant 4 : index
    %c0_44 = arith.constant 0 : index
    %c0_45 = arith.constant 0 : index
    %36 = vector.load %arg3[%c0_43, %c4, %c0_44, %c0_45] : memref<1x9x32x4xf32, #tpu.memory_space<vmem>>, vector<1x1x32x4xf32>
    %37 = vector.shape_cast %36 : vector<1x1x32x4xf32> to vector<32x4xf32>
    %c0_46 = arith.constant 0 : index
    %c0_47 = arith.constant 0 : index
    %c19 = arith.constant 19 : index
    %38 = vector.load %arg2[%c0_46, %c0_47, %c19] : memref<1x4x432xf32, #tpu.memory_space<vmem>>, vector<1x4x384xf32>
    %39 = vector.shape_cast %38 : vector<1x4x384xf32> to vector<4x384xf32>
    %cst_48 = arith.constant dense<0.000000e+00> : vector<32x384xf32>
    %40 = tpu.matmul %37, %39, %cst_48 {dimension_numbers = #tpu.dot_dimension_numbers<[1], [0], [0], [1], [0, 0, 1, 1], [], []>} : vector<32x4xf32>, vector<4x384xf32>, vector<32x384xf32> -> vector<32x384xf32>
    %41 = arith.addf %35, %40 : vector<32x384xf32>
    %c0_49 = arith.constant 0 : index
    %c0_50 = arith.constant 0 : index
    %42 = vector.load %arg6[%c0_49, %c0_50] : memref<32x384xf32, #tpu.memory_space<vmem>>, vector<32x384xf32>
    tpu.vector_store %arg6[%c0_49, %c0_50], %41 {strides = array<i32>} : memref<32x384xf32, #tpu.memory_space<vmem>>, vector<32x384xf32>,
    %c0_51 = arith.constant 0 : index
    %c0_52 = arith.constant 0 : index
    %43 = vector.load %arg6[%c0_51, %c0_52] : memref<32x384xf32, #tpu.memory_space<vmem>>, vector<32x384xf32>
    %c0_53 = arith.constant 0 : index
    %c5 = arith.constant 5 : index
    %c0_54 = arith.constant 0 : index
    %c0_55 = arith.constant 0 : index
    %44 = vector.load %arg3[%c0_53, %c5, %c0_54, %c0_55] : memref<1x9x32x4xf32, #tpu.memory_space<vmem>>, vector<1x1x32x4xf32>
    %45 = vector.shape_cast %44 : vector<1x1x32x4xf32> to vector<32x4xf32>
    %c0_56 = arith.constant 0 : index
    %c0_57 = arith.constant 0 : index
    %c20 = arith.constant 20 : index
    %46 = vector.load %arg2[%c0_56, %c0_57, %c20] : memref<1x4x432xf32, #tpu.memory_space<vmem>>, vector<1x4x384xf32>
    %47 = vector.shape_cast %46 : vector<1x4x384xf32> to vector<4x384xf32>
    %cst_58 = arith.constant dense<0.000000e+00> : vector<32x384xf32>
    %48 = tpu.matmul %45, %47, %cst_58 {dimension_numbers = #tpu.dot_dimension_numbers<[1], [0], [0], [1], [0, 0, 1, 1], [], []>} : vector<32x4xf32>, vector<4x384xf32>, vector<32x384xf32> -> vector<32x384xf32>
    %49 = arith.addf %43, %48 : vector<32x384xf32>
    %c0_59 = arith.constant 0 : index
    %c0_60 = arith.constant 0 : index
    %50 = vector.load %arg6[%c0_59, %c0_60] : memref<32x384xf32, #tpu.memory_space<vmem>>, vector<32x384xf32>
    tpu.vector_store %arg6[%c0_59, %c0_60], %49 {strides = array<i32>} : memref<32x384xf32, #tpu.memory_space<vmem>>, vector<32x384xf32>,
    %c0_61 = arith.constant 0 : index
    %c0_62 = arith.constant 0 : index
    %51 = vector.load %arg6[%c0_61, %c0_62] : memref<32x384xf32, #tpu.memory_space<vmem>>, vector<32x384xf32>
    %c0_63 = arith.constant 0 : index
    %c6 = arith.constant 6 : index
    %c0_64 = arith.constant 0 : index
    %c0_65 = arith.constant 0 : index
    %52 = vector.load %arg3[%c0_63, %c6, %c0_64, %c0_65] : memref<1x9x32x4xf32, #tpu.memory_space<vmem>>, vector<1x1x32x4xf32>
    %53 = vector.shape_cast %52 : vector<1x1x32x4xf32> to vector<32x4xf32>
    %c0_66 = arith.constant 0 : index
    %c0_67 = arith.constant 0 : index
    %c36 = arith.constant 36 : index
    %54 = vector.load %arg2[%c0_66, %c0_67, %c36] : memref<1x4x432xf32, #tpu.memory_space<vmem>>, vector<1x4x384xf32>
    %55 = vector.shape_cast %54 : vector<1x4x384xf32> to vector<4x384xf32>
    %cst_68 = arith.constant dense<0.000000e+00> : vector<32x384xf32>
    %56 = tpu.matmul %53, %55, %cst_68 {dimension_numbers = #tpu.dot_dimension_numbers<[1], [0], [0], [1], [0, 0, 1, 1], [], []>} : vector<32x4xf32>, vector<4x384xf32>, vector<32x384xf32> -> vector<32x384xf32>
    %57 = arith.addf %51, %56 : vector<32x384xf32>
    %c0_69 = arith.constant 0 : index
    %c0_70 = arith.constant 0 : index
    %58 = vector.load %arg6[%c0_69, %c0_70] : memref<32x384xf32, #tpu.memory_space<vmem>>, vector<32x384xf32>
    tpu.vector_store %arg6[%c0_69, %c0_70], %57 {strides = array<i32>} : memref<32x384xf32, #tpu.memory_space<vmem>>, vector<32x384xf32>,
    %c0_71 = arith.constant 0 : index
    %c0_72 = arith.constant 0 : index
    %59 = vector.load %arg6[%c0_71, %c0_72] : memref<32x384xf32, #tpu.memory_space<vmem>>, vector<32x384xf32>
    %c0_73 = arith.constant 0 : index
    %c7 = arith.constant 7 : index
    %c0_74 = arith.constant 0 : index
    %c0_75 = arith.constant 0 : index
    %60 = vector.load %arg3[%c0_73, %c7, %c0_74, %c0_75] : memref<1x9x32x4xf32, #tpu.memory_space<vmem>>, vector<1x1x32x4xf32>
    %61 = vector.shape_cast %60 : vector<1x1x32x4xf32> to vector<32x4xf32>
    %c0_76 = arith.constant 0 : index
    %c0_77 = arith.constant 0 : index
    %c37 = arith.constant 37 : index
    %62 = vector.load %arg2[%c0_76, %c0_77, %c37] : memref<1x4x432xf32, #tpu.memory_space<vmem>>, vector<1x4x384xf32>
    %63 = vector.shape_cast %62 : vector<1x4x384xf32> to vector<4x384xf32>
    %cst_78 = arith.constant dense<0.000000e+00> : vector<32x384xf32>
    %64 = tpu.matmul %61, %63, %cst_78 {dimension_numbers = #tpu.dot_dimension_numbers<[1], [0], [0], [1], [0, 0, 1, 1], [], []>} : vector<32x4xf32>, vector<4x384xf32>, vector<32x384xf32> -> vector<32x384xf32>
    %65 = arith.addf %59, %64 : vector<32x384xf32>
    %c0_79 = arith.constant 0 : index
    %c0_80 = arith.constant 0 : index
    %66 = vector.load %arg6[%c0_79, %c0_80] : memref<32x384xf32, #tpu.memory_space<vmem>>, vector<32x384xf32>
    tpu.vector_store %arg6[%c0_79, %c0_80], %65 {strides = array<i32>} : memref<32x384xf32, #tpu.memory_space<vmem>>, vector<32x384xf32>,
    %c0_81 = arith.constant 0 : index
    %c0_82 = arith.constant 0 : index
    %67 = vector.load %arg6[%c0_81, %c0_82] : memref<32x384xf32, #tpu.memory_space<vmem>>, vector<32x384xf32>
    %c0_83 = arith.constant 0 : index
    %c8 = arith.constant 8 : index
    %c0_84 = arith.constant 0 : index
    %c0_85 = arith.constant 0 : index
    %68 = vector.load %arg3[%c0_83, %c8, %c0_84, %c0_85] : memref<1x9x32x4xf32, #tpu.memory_space<vmem>>, vector<1x1x32x4xf32>
    %69 = vector.shape_cast %68 : vector<1x1x32x4xf32> to vector<32x4xf32>
    %c0_86 = arith.constant 0 : index
    %c0_87 = arith.constant 0 : index
    %c38 = arith.constant 38 : index
    %70 = vector.load %arg2[%c0_86, %c0_87, %c38] : memref<1x4x432xf32, #tpu.memory_space<vmem>>, vector<1x4x384xf32>
    %71 = vector.shape_cast %70 : vector<1x4x384xf32> to vector<4x384xf32>
    %cst_88 = arith.constant dense<0.000000e+00> : vector<32x384xf32>
    %72 = tpu.matmul %69, %71, %cst_88 {dimension_numbers = #tpu.dot_dimension_numbers<[1], [0], [0], [1], [0, 0, 1, 1], [], []>} : vector<32x4xf32>, vector<4x384xf32>, vector<32x384xf32> -> vector<32x384xf32>
    %73 = arith.addf %67, %72 : vector<32x384xf32>
    %c0_89 = arith.constant 0 : index
    %c0_90 = arith.constant 0 : index
    %74 = vector.load %arg6[%c0_89, %c0_90] : memref<32x384xf32, #tpu.memory_space<vmem>>, vector<32x384xf32>
    tpu.vector_store %arg6[%c0_89, %c0_90], %73 {strides = array<i32>} : memref<32x384xf32, #tpu.memory_space<vmem>>, vector<32x384xf32>,
    %c0_i32_91 = arith.constant 0 : i32
    %75 = arith.cmpi eq, %arg1, %c0_i32_91 : i32
    %76 = arith.extui %75 : i1 to i32
    %c0_i32_92 = arith.constant 0 : i32
    %77 = arith.cmpi ne, %76, %c0_i32_92 : i32
    scf.if %77 {
      %c0_93 = arith.constant 0 : index
      %c0_94 = arith.constant 0 : index
      %78 = vector.load %arg6[%c0_93, %c0_94] : memref<32x384xf32, #tpu.memory_space<vmem>>, vector<32x384xf32>
      %c0_95 = arith.constant 0 : index
      %c0_96 = arith.constant 0 : index
      %79 = vector.load %arg4[%c0_95, %c0_96] : memref<32x1xf32, #tpu.memory_space<vmem>>, vector<32x1xf32>
      %80 = vector.broadcast %79 : vector<32x1xf32> to vector<32x384xf32>
      %81 = arith.addf %78, %80 : vector<32x384xf32>
      %82 = vector.extract_strided_slice %81 {offsets = [0, 0], sizes = [1, 384], strides = [1, 1]} : vector<32x384xf32> to vector<1x384xf32>
      %83 = vector.extract_strided_slice %81 {offsets = [1, 0], sizes = [1, 384], strides = [1, 1]} : vector<32x384xf32> to vector<1x384xf32>
      %84 = arith.subf %82, %83 : vector<1x384xf32>
      %cst_97 = arith.constant 0.000000e+00 : f32
      %85 = vector.broadcast %cst_97 : f32 to vector<1x384xf32>
      %86 = arith.subf %85, %84 : vector<1x384xf32>
      %87 = math.exp %86 : vector<1x384xf32>
      %cst_98 = arith.constant 1.000000e+00 : f32
      %88 = vector.broadcast %cst_98 : f32 to vector<1x384xf32>
      %89 = arith.addf %88, %87 : vector<1x384xf32>
      %cst_99 = arith.constant 1.000000e+00 : f32
      %90 = vector.broadcast %cst_99 : f32 to vector<1x384xf32>
      %91 = arith.divf %90, %89 : vector<1x384xf32>
      %92 = vector.extract_strided_slice %81 {offsets = [2, 0], sizes = [1, 384], strides = [1, 1]} : vector<32x384xf32> to vector<1x384xf32>
      %93 = vector.extract_strided_slice %81 {offsets = [3, 0], sizes = [1, 384], strides = [1, 1]} : vector<32x384xf32> to vector<1x384xf32>
      %94 = arith.subf %92, %93 : vector<1x384xf32>
      %cst_100 = arith.constant 0.000000e+00 : f32
      %95 = vector.broadcast %cst_100 : f32 to vector<1x384xf32>
      %96 = arith.subf %95, %94 : vector<1x384xf32>
      %97 = math.exp %96 : vector<1x384xf32>
      %cst_101 = arith.constant 1.000000e+00 : f32
      %98 = vector.broadcast %cst_101 : f32 to vector<1x384xf32>
      %99 = arith.addf %98, %97 : vector<1x384xf32>
      %cst_102 = arith.constant 1.000000e+00 : f32
      %100 = vector.broadcast %cst_102 : f32 to vector<1x384xf32>
      %101 = arith.divf %100, %99 : vector<1x384xf32>
      %c0_103 = arith.constant 0 : index
      %c0_104 = arith.constant 0 : index
      %c0_105 = arith.constant 0 : index
      %102 = vector.load %arg5[%c0_103, %c0_104, %c0_105] : memref<1x32x384xf32, #tpu.memory_space<vmem>>, vector<1x32x384xf32>
      %103 = vector.shape_cast %102 : vector<1x32x384xf32> to vector<32x384xf32>
      %104 = vector.shape_cast %81 : vector<32x384xf32> to vector<1x32x384xf32>
      tpu.vector_store %arg5[%c0_103, %c0_104, %c0_105], %104 {strides = array<i32>} : memref<1x32x384xf32, #tpu.memory_space<vmem>>, vector<1x32x384xf32>,
      %c0_106 = arith.constant 0 : index
      %c0_107 = arith.constant 0 : index
      %c0_108 = arith.constant 0 : index
      %105 = vector.load %arg5[%c0_106, %c0_107, %c0_108] : memref<1x32x384xf32, #tpu.memory_space<vmem>>, vector<1x1x384xf32>
      %106 = vector.shape_cast %105 : vector<1x1x384xf32> to vector<1x384xf32>
      %107 = vector.shape_cast %91 : vector<1x384xf32> to vector<1x1x384xf32>
      tpu.vector_store %arg5[%c0_106, %c0_107, %c0_108], %107 {strides = array<i32>} : memref<1x32x384xf32, #tpu.memory_space<vmem>>, vector<1x1x384xf32>,
      %cst_109 = arith.constant 1.000000e+00 : f32
      %108 = vector.broadcast %cst_109 : f32 to vector<1x384xf32>
      %109 = arith.subf %108, %91 : vector<1x384xf32>
      %c0_110 = arith.constant 0 : index
      %c1_111 = arith.constant 1 : index
      %c0_112 = arith.constant 0 : index
      %110 = vector.load %arg5[%c0_110, %c1_111, %c0_112] : memref<1x32x384xf32, #tpu.memory_space<vmem>>, vector<1x1x384xf32>
      %111 = vector.shape_cast %110 : vector<1x1x384xf32> to vector<1x384xf32>
      %112 = vector.shape_cast %109 : vector<1x384xf32> to vector<1x1x384xf32>
      tpu.vector_store %arg5[%c0_110, %c1_111, %c0_112], %112 {strides = array<i32>} : memref<1x32x384xf32, #tpu.memory_space<vmem>>, vector<1x1x384xf32>,
      %c0_113 = arith.constant 0 : index
      %c2_114 = arith.constant 2 : index
      %c0_115 = arith.constant 0 : index
      %113 = vector.load %arg5[%c0_113, %c2_114, %c0_115] : memref<1x32x384xf32, #tpu.memory_space<vmem>>, vector<1x1x384xf32>
      %114 = vector.shape_cast %113 : vector<1x1x384xf32> to vector<1x384xf32>
      %115 = vector.shape_cast %101 : vector<1x384xf32> to vector<1x1x384xf32>
      tpu.vector_store %arg5[%c0_113, %c2_114, %c0_115], %115 {strides = array<i32>} : memref<1x32x384xf32, #tpu.memory_space<vmem>>, vector<1x1x384xf32>,
      %cst_116 = arith.constant 1.000000e+00 : f32
      %116 = vector.broadcast %cst_116 : f32 to vector<1x384xf32>
      %117 = arith.subf %116, %101 : vector<1x384xf32>
      %c0_117 = arith.constant 0 : index
      %c3_118 = arith.constant 3 : index
      %c0_119 = arith.constant 0 : index
      %118 = vector.load %arg5[%c0_117, %c3_118, %c0_119] : memref<1x32x384xf32, #tpu.memory_space<vmem>>, vector<1x1x384xf32>
      %119 = vector.shape_cast %118 : vector<1x1x384xf32> to vector<1x384xf32>
      %120 = vector.shape_cast %117 : vector<1x384xf32> to vector<1x1x384xf32>
      tpu.vector_store %arg5[%c0_117, %c3_118, %c0_119], %120 {strides = array<i32>} : memref<1x32x384xf32, #tpu.memory_space<vmem>>, vector<1x1x384xf32>,
    } else {
    }
    return
  }
  func.func @transform_0(%arg0: i32, %arg1: i32) -> (i32, i32, i32) {
    %c0_i32 = arith.constant 0 : i32
    %c0_i32_0 = arith.constant 0 : i32
    return %arg0, %arg1, %c0_i32 : i32, i32, i32
  }
  func.func @transform_1(%arg0: i32, %arg1: i32) -> (i32, i32, i32, i32) {
    %c0_i32 = arith.constant 0 : i32
    %c0_i32_0 = arith.constant 0 : i32
    %c0_i32_1 = arith.constant 0 : i32
    %c0_i32_2 = arith.constant 0 : i32
    return %arg1, %c0_i32, %c0_i32_0, %c0_i32_1 : i32, i32, i32, i32
  }
  func.func @transform_2(%arg0: i32, %arg1: i32) -> (i32, i32) {
    %c0_i32 = arith.constant 0 : i32
    %c0_i32_0 = arith.constant 0 : i32
    %c0_i32_1 = arith.constant 0 : i32
    return %c0_i32, %c0_i32_0 : i32, i32
  }
  func.func @transform_3(%arg0: i32, %arg1: i32) -> (i32, i32, i32) {
    %c0_i32 = arith.constant 0 : i32
    %c0_i32_0 = arith.constant 0 : i32
    %c0_i32_1 = arith.constant 0 : i32
    return %arg0, %c0_i32, %c0_i32_0 : i32, i32, i32
  }
}

</mosaic_0001>

<bundles_post_ra>
// kernel: _fce_level_forward.1
= control target key start
LH: loop header
LB: loop body
LE: loop exit
PB: predicated region body
PF: predicated region fallthrough
CT: control target
= control target key end

     0   :  { %s2301_s12 = smov 0   ;;  %s2303_s13 = smov 0   ;;  %s2848_s0 = inlined_call_operand.vmem [shape: f32[2,4,432], index: 0, kind: input, shape index: {}]   ;;  %s2849_s1 = inlined_call_operand.vmem [shape: f32[1,9,32,4], index: 1, kind: input, shape index: {}]   ;;  %s2850_s2 = inlined_call_operand.vmem [shape: f32[32,1], index: 2, kind: input, shape index: {}]   ;;  %s2851_s3 = inlined_call_operand.vmem [shape: f32[2,32,384], index: 3, kind: output, shape index: {}]  }
   0x1   :  { %s2305_s14 = smov 0  }
   0x2 LB: > { %s25_s15 = sadd.s32 1, %s2266_s13  ;;  %p2019_p0 = scmp.ge.s32.totalorder %s2270_s14, 1  ;;  %s2270_s14 = sphi %s2305_s14, %s13_s14   ;;  %s2266_s13 = sphi %s2303_s13, %s2853_s13   ;;  %s2262_s12 = sphi %s2301_s12, %s2852_s12  }
   0x3   : > { %p27_p1 = scmp.ge.s32.totalorder %s25_s15, 2  ;;  %p165_p2 = scmp.lt.s32.totalorder %s2270_s14, 3 }
   0x5   : > { %s2855_s15 = smov (%p27_p1, %s25_s15), 0  ;;  %p166_p3 = pnand %p2019_p0, %p165_p2 }
   0x6   : > { %p198_p4 = scmp.lt.s32.totalorder (!%p166_p3), %s2262_s12, 1  ;;  %s2272_s20 = smov (!%p166_p3), 127  }
   0x7   : > { %169 = sbr.rel (%p166_p3) target bundleno = 516 (0x204), region = 32  ;;  %s2273_s21 = smov (!%p166_p3), 126  }
   0x8   : > { %s2274_s24 = smov (!%p166_p3), 110   ;;  %s2275_s29 = smov (!%p166_p3), 109  }
   0x9   : > { %s2276_s30 = smov (!%p166_p3), 108   ;;  %s2277_s4 = smov (!%p166_p3), 92  }
   0xa   : > { %s2278_s7 = smov (!%p166_p3), 91   ;;  %s2279_s18 = smov (!%p166_p3), 90  }
   0xc   : > { %s2857_s12 = smov (!%p198_p4, %s2262_s12), 1  ;;  %vm244_vm0 = vcmask 1043456   ;;  %v218_v16 = vld [vmem:[%s2849_s1 + $0x8] sm:$0xff]  ;;  %vm231_vm1 = vcmask 31744   ;;  %v217_v21 = vld [vmem:[%s2849_s1] sm:$0xff]  ;;  %v219_v22 = vld [vmem:[%s2849_s1 + $0x10] sm:$0xff] }
   0xd   : > { %s2195_s16 = sshll.u32 %s2857_s12, 4  ;;  %v220_v33 = vld [vmem:[%s2849_s1 + $0x18] sm:$0xff]  ;;  %vm430_vm2 = vcmask 1039360   ;;  %v2038_v37 = vld [vmem:[%s2849_s1 + $0x20] sm:$0xff]  ;;  %v2039_v40 = vld [vmem:[%s2849_s1 + $0x28] sm:$0xff]  ;;  %vm599_vm3 = vcmask 1031168  }
   0xe   : > { %s206_s19 = scalar_lea.vmem %s2848_s0, %s2195_s16  ;;  %v2040_v43 = vld [vmem:[%s2849_s1 + $0x30] sm:$0xff]  ;;  %v2041_v51 = vld [vmem:[%s2849_s1 + $0x38] sm:$0xff]  ;;  %vm768_vm4 = vcmask 900096   ;;  %v2057_v58 = vld [vmem:[%s2849_s1 + $0x40] sm:$0xff]  ;;  %vm937_vm5 = vcmask 891904   ;;  %vm1106_vm6 = vcmask 883712  }
   0xf   : > { %v2325_v0 = vld [vmem:[%s206_s19] sm:$0xff]  ;;  %v222_v1 = vld [vmem:[%s206_s19 + $0x8] sm:$0xf]  ;;  %vm1275_vm7 = vcmask 752640   ;;  %vm1444_vm8 = vcmask 744448   ;;  %vm1613_vm9 = vcmask 736256  }
  0x10   : > { %225 = vst [vmem:[#allocation1] ss:$2 sm:$0xff] %v2325_v0  ;;  %v2328_v2 = vld [vmem:[%s206_s19 + $0x8] sm:$0xff]  ;;  %s2199_s16 = smul.u32 96, %s2857_s12 }
  0x11   : > { %227 = vst [vmem:[#allocation1 + $0x10] ss:$2 sm:$0xff] %v222_v1  ;;  %v2058_v63 = vld [vmem:[%s2849_s1 + $0x48] sm:$0xff] }
  0x12   : > { %s2770_s19 = scalar_lea.vmem %s2851_s3, %s2199_s16 }
  0x17   : > { %v228_v3 = vld.sshfl [vmem:[#allocation1] sm:$0xff pattern:$0x75316420]  ;;  %v229_v4 = vld.sshfl [vmem:[#allocation1 + $0x8] sm:$0xff pattern:$0x75316420] }
  0x18   : > { %415 = vst [vmem:[#allocation1] ss:$2 sm:$0xff] %v2325_v0  ;;  %v230_v5 = vld.sshfl [vmem:[#allocation1 + $0x10] sm:$0xff pattern:$0x75316420]  ;;  %2197 = vmatpush.msk.msra.mxu1 %vm244_vm0, %v229_v4  ;;  %2023 = vmatpush.msk.msra.mxu0 %vm244_vm0, %v228_v3 }
  0x19   : > { %417 = vst [vmem:[#allocation1 + $0x10] ss:$2 sm:$0xff] %v2328_v2  ;;  %2030 = vmatmul.msk.f32.vlgmr.msra.gmra.mxu1 %vm231_vm1, %v218_v16  ;;  %2196 = vmatpush.msk.msra.mxu3 %vm244_vm0, %v228_v3 }
  0x1a   : > { %2028 = vmatpush.msk.msrb.mxu0 %vm244_vm0, %v229_v4  ;;  %2025 = vmatmul.msk.f32.vlgmr.msra.gmra.mxu3 %vm231_vm1, %v218_v16 }
  0x1b   : > { %2198 = vmatpush.msk.msra.mxu2 %vm244_vm0, %v230_v5  ;;  %2024 = vmatmul.msk.f32.vlgmr.msra.gmra.mxu0 %vm231_vm1, %v217_v21 }
  0x1c   : > { %2035 = vmatmul.msk.f32.vlgmr.msra.gmra.mxu2 %vm231_vm1, %v218_v16  ;;  %2033 = vmatpush.msk.msra.mxu0 %vm244_vm0, %v230_v5  ;;  %v2059_v5 = vld [vmem:[%s2849_s1 + $0x50] sm:$0xff] }
  0x1d   : > { %v2078_v16 = vld [vmem:[%s2849_s1 + $0x70] sm:$0xff] }
  0x1f   : > { %v418_v6 = vld.sshfl [vmem:[#allocation1] sm:$0xff pattern:$0x75316420]  ;;  %v419_v7 = vld.sshfl [vmem:[#allocation1 + $0x8] sm:$0xff pattern:$0x75316420] }
  0x20   : > { %422 = vrot.lane.b32.xlu0 %v418_v6, %s2272_s20  ;;  %584 = vst [vmem:[#allocation1] ss:$2 sm:$0xff] %v2325_v0  ;;  %v420_v8 = vld.sshfl [vmem:[#allocation1 + $0x10] sm:$0xff pattern:$0x75316420]  ;;  %v2076_v6 = vld [vmem:[%s2849_s1 + $0x60] sm:$0xff] }
  0x21   : > { %426 = vrot.lane.b32.xlu2 %v420_v8, %s2272_s20  ;;  %v421_v9 = vld.sshfl [vmem:[#allocation1 + $0x18] sm:$0xff pattern:$0x75316420]  ;;  %2031 = vmatmul.msk.f32.gmra.mxu1 %vm231_vm1, %v219_v22 }
  0x22   : > { %586 = vst [vmem:[#allocation1 + $0x10] ss:$2 sm:$0xff] %v2328_v2  ;;  %2026 = vmatmul.msk.f32.gmra.mxu3 %vm231_vm1, %v219_v22 }
  0x23   : > { %2029 = vmatmul.msk.f32.vlgmr.msrb.gmra.mxu0 %vm231_vm1, %v217_v21 }
  0x24   : > { %2036 = vmatmul.msk.f32.gmra.mxu2 %vm231_vm1, %v219_v22 }
  0x27   : > { %v587_v10 = vld.sshfl [vmem:[#allocation1] sm:$0xff pattern:$0x75316420]  ;;  %v588_v11 = vld.sshfl [vmem:[#allocation1 + $0x8] sm:$0xff pattern:$0x75316420] }
  0x28   : > { %424 = vrot.lane.b32.xlu0 %v419_v7, %s2272_s20  ;;  %591 = vrot.lane.b32.xlu1 %v587_v10, %s2273_s21  ;;  %753 = vst [vmem:[#allocation1] ss:$2 sm:$0xff] %v2325_v0  ;;  %v2060_v10 = vld [vmem:[%s2849_s1 + $0x58] sm:$0xff] }
  0x29   : > { %v589_v12 = vld.sshfl [vmem:[#allocation1 + $0x10] sm:$0xff pattern:$0x75316420]  ;;  %428 = vrot.lane.b32.xlu2 %v421_v9, %s2272_s20  ;;  %v590_v13 = vld.sshfl [vmem:[#allocation1 + $0x18] sm:$0xff pattern:$0x75316420]  ;;  %2032 = vmatmul.msk.f32.gmra.mxu1 %vm231_vm1, %v220_v33 }
  0x2a   : > { %755 = vst [vmem:[#allocation1 + $0x10] ss:$2 sm:$0xff] %v2328_v2  ;;  %2027 = vmatmul.msk.f32.gmra.mxu3 %vm231_vm1, %v220_v33 }
  0x2b   : > { %2034 = vmatmul.msk.f32.vlgmr.msra.gmra.mxu0 %vm231_vm1, %v217_v21  ;;  %v2079_v21 = vld [vmem:[%s2849_s1 + $0x78] sm:$0xff] }
  0x2c   : > { %2037 = vmatmul.msk.f32.gmra.mxu2 %vm231_vm1, %v220_v33 }
  0x2f   : > { %v757_v14 = vld.sshfl [vmem:[#allocation1 + $0x8] sm:$0xff pattern:$0x75316420]  ;;  %v756_v15 = vld.sshfl [vmem:[#allocation1] sm:$0xff pattern:$0x75316420] }
  0x30   : > { %595 = vrot.lane.b32.xlu0 %v589_v12, %s2273_s21  ;;  %593 = vrot.lane.b32.xlu1 %v588_v11, %s2273_s21  ;;  %922 = vst [vmem:[#allocation1] ss:$2 sm:$0xff] %v2325_v0  ;;  %v2077_v11 = vld [vmem:[%s2849_s1 + $0x68] sm:$0xff] }
  0x31   : > { %v758_v17 = vld.sshfl [vmem:[#allocation1 + $0x10] sm:$0xff pattern:$0x75316420]  ;;  %v759_v18 = vld.sshfl [vmem:[#allocation1 + $0x18] sm:$0xff pattern:$0x75316420] }
  0x32   : > { %764 = vrot.lane.b32.xlu2 %v758_v17, %s2274_s24  ;;  %924 = vst [vmem:[#allocation1 + $0x10] ss:$2 sm:$0xff] %v2328_v2 }
  0x37   : > { %v925_v19 = vld.sshfl [vmem:[#allocation1] sm:$0xff pattern:$0x75316420]  ;;  %v926_v20 = vld.sshfl [vmem:[#allocation1 + $0x8] sm:$0xff pattern:$0x75316420] }
  0x38   : > { %762 = vrot.lane.b32.xlu1 %v757_v14, %s2274_s24  ;;  %597 = vrot.lane.b32.xlu0 %v590_v13, %s2273_s21  ;;  %1091 = vst [vmem:[#allocation1] ss:$2 sm:$0xff] %v2325_v0 }
  0x39   : > { %v927_v23 = vld.sshfl [vmem:[#allocation1 + $0x10] sm:$0xff pattern:$0x75316420]  ;;  %v928_v24 = vld.sshfl [vmem:[#allocation1 + $0x18] sm:$0xff pattern:$0x75316420] }
  0x3a   : > { %766 = vrot.lane.b32.xlu2 %v759_v18, %s2274_s24  ;;  %1093 = vst [vmem:[#allocation1 + $0x10] ss:$2 sm:$0xff] %v2328_v2 }
  0x3f   : > { %v1094_v25 = vld.sshfl [vmem:[#allocation1] sm:$0xff pattern:$0x75316420]  ;;  %v1095_v26 = vld.sshfl [vmem:[#allocation1 + $0x8] sm:$0xff pattern:$0x75316420] }
  0x40   : > { %760 = vrot.lane.b32.xlu1 %v756_v15, %s2274_s24  ;;  %933 = vrot.lane.b32.xlu0 %v927_v23, %s2275_s29  ;;  %1260 = vst [vmem:[#allocation1] ss:$2 sm:$0xff] %v2325_v0 }
  0x41   : > { %v1096_v27 = vld.sshfl [vmem:[#allocation1 + $0x10] sm:$0xff pattern:$0x75316420]  ;;  %v1097_v28 = vld.sshfl [vmem:[#allocation1 + $0x18] sm:$0xff pattern:$0x75316420] }
  0x42   : > { %929 = vrot.lane.b32.xlu2 %v925_v19, %s2275_s29  ;;  %1262 = vst [vmem:[#allocation1 + $0x10] ss:$2 sm:$0xff] %v2328_v2 }
  0x47   : > { %v1263_v29 = vld.sshfl [vmem:[#allocation1] sm:$0xff pattern:$0x75316420]  ;;  %v1264_v30 = vld.sshfl [vmem:[#allocation1 + $0x8] sm:$0xff pattern:$0x75316420] }
  0x48   : > { %931 = vrot.lane.b32.xlu0 %v926_v20, %s2275_s29  ;;  %935 = vrot.lane.b32.xlu1 %v928_v24, %s2275_s29  ;;  %1429 = vst [vmem:[#allocation1] ss:$2 sm:$0xff] %v2325_v0 }
  0x49   : > { %v1265_v31 = vld.sshfl [vmem:[#allocation1 + $0x10] sm:$0xff pattern:$0x75316420]  ;;  %v1266_v32 = vld.sshfl [vmem:[#allocation1 + $0x18] sm:$0xff pattern:$0x75316420] }
  0x4a   : > { %1100 = vrot.lane.b32.xlu2 %v1095_v26, %s2276_s30  ;;  %1431 = vst [vmem:[#allocation1 + $0x10] ss:$2 sm:$0xff] %v2328_v2 }
  0x4f   : > { %v1433_v41 = vld.sshfl [vmem:[#allocation1 + $0x8] sm:$0xff pattern:$0x75316420]  ;;  %v1432_v46 = vld.sshfl [vmem:[#allocation1] sm:$0xff pattern:$0x75316420] }
  0x50   : > { %1098 = vrot.lane.b32.xlu1 %v1094_v25, %s2276_s30  ;;  %1267 = vrot.lane.b32.xlu0 %v1263_v29, %s2277_s4  ;;  %1598 = vst [vmem:[#allocation1] ss:$2 sm:$0xff] %v2325_v0 }
  0x51   : > { %v1434_v35 = vld.sshfl [vmem:[#allocation1 + $0x10] sm:$0xff pattern:$0x75316420]  ;;  %v1435_v39 = vld.sshfl [vmem:[#allocation1 + $0x18] sm:$0xff pattern:$0x75316420] }
  0x52   : > { %1102 = vrot.lane.b32.xlu2 %v1096_v27, %s2276_s30  ;;  %1600 = vst [vmem:[#allocation1 + $0x10] ss:$2 sm:$0xff] %v2328_v2 }
  0x57   : > { %v1602_v52 = vld.sshfl [vmem:[#allocation1 + $0x8] sm:$0xff pattern:$0x75316420]  ;;  %v1601_v60 = vld.sshfl [vmem:[#allocation1] sm:$0xff pattern:$0x75316420] }
  0x58   : > { %1269 = vrot.lane.b32.xlu1 %v1264_v30, %s2277_s4  ;;  %1104 = vrot.lane.b32.xlu0 %v1097_v28, %s2276_s30  ;;  %v2095_v28 = vld [vmem:[%s2849_s1 + $0x80] sm:$0xff]  ;;  %v2096_v30 = vld [vmem:[%s2849_s1 + $0x88] sm:$0xff] }
  0x59   : > { %v1603_v45 = vld.sshfl [vmem:[#allocation1 + $0x10] sm:$0xff pattern:$0x75316420]  ;;  %v1604_v15 = vld.sshfl [vmem:[#allocation1 + $0x18] sm:$0xff pattern:$0x75316420] }
  0x5a   : > { %1438 = vrot.lane.b32.xlu2 %v1433_v41, %s2278_s7 }
  0x60   : > { %1271 = vrot.lane.b32.xlu1 %v1265_v31, %s2277_s4  ;;  %1440 = vrot.lane.b32.xlu0 %v1434_v35, %s2278_s7 }
  0x62   : > { %1436 = vrot.lane.b32.xlu2 %v1432_v46, %s2278_s7 }
  0x68   : > { %1273 = vrot.lane.b32.xlu1 %v1266_v32, %s2277_s4  ;;  %1442 = vrot.lane.b32.xlu0 %v1435_v39, %s2278_s7  ;;  %v2097_v32 = vld [vmem:[%s2849_s1 + $0x90] sm:$0xff] }
  0x6a   : > { %1611 = vrot.lane.b32.xlu2 %v1604_v15, %s2279_s18 }
  0x70   : > { %1609 = vrot.lane.b32.xlu1 %v1603_v45, %s2279_s18  ;;  %1605 = vrot.lane.b32.xlu0 %v1601_v60, %s2279_s18  ;;  %v2115_v45 = vld [vmem:[%s2849_s1 + $0xa8] sm:$0xff]  ;;  %v2135_v60 = vld [vmem:[%s2849_s1 + $0xd0] sm:$0xff] }
  0x78   : > { %1607 = vrot.lane.b32.xlu1 %v1602_v52, %s2279_s18 }
  0x7b   : > { %v427_v34 = vpop.permute.xlu2 %426 }
  0x83   : > { %v429_v36 = vpop.permute.xlu2 %428 }
  0x84   : > { %v433_v38 = vsel %vm430_vm2, %v427_v34, %v429_v36 }
  0x85   : > { %2052 = vmatpush.msk.msrb.mxu1 %vm244_vm0, %v433_v38 }
  0x86   : > { %2053 = vmatmul.msk.f32.vlgmr.msrb.gmra.mxu1 %vm231_vm1, %v2038_v37 }
  0x8c   : > { %v765_v44 = vpop.permute.xlu2 %764 }
  0x8e   : > { %2054 = vmatmul.msk.f32.gmra.mxu1 %vm231_vm1, %v2039_v40 }
  0x92   : > { %v423_v42 = vpop.permute.xlu0 %422 }
  0x94   : > { %v767_v53 = vpop.permute.xlu2 %766 }
  0x95   : > { %v771_v59 = vsel %vm768_vm4, %v765_v44, %v767_v53 }
  0x96   : > { %2055 = vmatmul.msk.f32.gmra.mxu1 %vm231_vm1, %v2040_v43  ;;  %v2507_v35 = vpop.f32.mrf.mxu1 }
  0x98   : > { %v268_v46 = vpop.f32.mrf.mxu0 }
  0x9a   : > { %v425_v47 = vpop.permute.xlu0 %424  ;;  %v592_v48 = vpop.permute.xlu1 %591 }
  0x9b   : > { %v432_v49 = vsel %vm430_vm2, %v425_v47, %v427_v34  ;;  %v431_v50 = vsel %vm430_vm2, %v423_v42, %v425_v47  ;;  %v2098_v34 = vld [vmem:[%s2849_s1 + $0x98] sm:$0xff] }
  0x9c   : > { %2042 = vmatpush.msk.msrb.mxu3 %vm244_vm0, %v431_v50  ;;  %2047 = vmatpush.msk.msrb.mxu0 %vm244_vm0, %v432_v49  ;;  %v930_v7 = vpop.permute.xlu2 %929  ;;  %v2116_v49 = vld [vmem:[%s2849_s1 + $0xb0] sm:$0xff]  ;;  %v2133_v50 = vld [vmem:[%s2849_s1 + $0xc0] sm:$0xff] }
  0x9d   : > { %2043 = vmatmul.msk.f32.vlgmr.msrb.gmra.mxu3 %vm231_vm1, %v2038_v37  ;;  %2048 = vmatmul.msk.f32.vlgmr.msrb.gmra.mxu0 %vm231_vm1, %v2038_v37 }
  0x9e   : > { %2056 = vmatmul.msk.f32.gmra.mxu1 %vm231_vm1, %v2041_v51 }
  0xa0   : > { %v2547_v52 = vpop.f32.mrf.mxu0 }
  0xa2   : > { %v596_v54 = vpop.permute.xlu0 %595  ;;  %v594_v55 = vpop.permute.xlu1 %593 }
  0xa3   : > { %v601_v56 = vsel %vm599_vm3, %v594_v55, %v596_v54  ;;  %v600_v57 = vsel %vm599_vm3, %v592_v48, %v594_v55  ;;  %v2533_v48 = vpop.f32.mrf.mxu3  ;;  %v2134_v55 = vld [vmem:[%s2849_s1 + $0xc8] sm:$0xff] }
  0xa4   : > { %2061 = vmatpush.msk.msrb.mxu2 %vm244_vm0, %v600_v57  ;;  %2066 = vmatpush.msk.msra.mxu3 %vm244_vm0, %v601_v56  ;;  %v1101_v17 = vpop.permute.xlu2 %1100  ;;  %v2555_v56 = vpop.f32.mrf.mxu2 }
  0xa5   : > { %2044 = vmatmul.msk.f32.gmra.mxu3 %vm231_vm1, %v2039_v40  ;;  %2049 = vmatmul.msk.f32.gmra.mxu0 %vm231_vm1, %v2039_v40  ;;  %v2114_v40 = vld [vmem:[%s2849_s1 + $0xa0] sm:$0xff] }
  0xa6   : > { %2062 = vmatmul.msk.f32.vlgmr.msrb.gmra.mxu2 %vm231_vm1, %v2057_v58  ;;  %2090 = vmatpush.msk.msrb.mxu3 %vm244_vm0, %v771_v59 }
  0xa8   : > { %v2565_v59 = vpop.f32.mrf.mxu0 }
  0xaa   : > { %v763_v61 = vpop.permute.xlu1 %762  ;;  %v598_v62 = vpop.permute.xlu0 %597 }
  0xab   : > { %v770_v0 = vsel %vm768_vm4, %v763_v61, %v765_v44  ;;  %v602_v1 = vsel %vm599_vm3, %v596_v54, %v598_v62  ;;  %v2117_v54 = vld [vmem:[%s2849_s1 + $0xb8] sm:$0xff]  ;;  %v2557_v57 = vpop.f32.mrf.mxu3 }
  0xac   : > { %2071 = vmatpush.msk.msra.mxu0 %vm244_vm0, %v602_v1  ;;  %2085 = vmatpush.msk.msra.mxu2 %vm244_vm0, %v770_v0  ;;  %v1103_v22 = vpop.permute.xlu2 %1102  ;;  %v2578_v0 = vpop.f32.mrf.mxu2 }
  0xad   : > { %2045 = vmatmul.msk.f32.gmra.mxu3 %vm231_vm1, %v2040_v43  ;;  %2050 = vmatmul.msk.f32.gmra.mxu0 %vm231_vm1, %v2040_v43  ;;  %v1108_v24 = vsel %vm1106_vm6, %v1101_v17, %v1103_v22  ;;  %v2522_v43 = vpop.f32.mrf.mxu1 }
  0xae   : > { %2063 = vmatmul.msk.f32.gmra.mxu2 %vm231_vm1, %v2058_v63 }
  0xb2   : > { %v761_v2 = vpop.permute.xlu1 %760  ;;  %v934_v3 = vpop.permute.xlu0 %933 }
  0xb3   : > { %v769_v4 = vsel %vm768_vm4, %v761_v2, %v763_v61  ;;  %v2573_v61 = vld [vmem:[%s2849_s1 + $0xe0] sm:$0xff]  ;;  %v277_v1 = vpop.f32.mrf.mxu3 }
  0xb4   : > { %2080 = vmatpush.msk.msra.mxu1 %vm244_vm0, %v769_v4  ;;  %v1439_v33 = vpop.permute.xlu2 %1438 }
  0xb5   : > { %2046 = vmatmul.msk.f32.gmra.mxu3 %vm231_vm1, %v2041_v51  ;;  %2051 = vmatmul.msk.f32.gmra.mxu0 %vm231_vm1, %v2041_v51  ;;  %v2541_v51 = vpop.f32.mrf.mxu1 }
  0xb6   : > { %2064 = vmatmul.msk.f32.gmra.mxu2 %vm231_vm1, %v2059_v5  ;;  %2081 = vmatmul.msk.f32.vlgmr.msra.gmra.mxu1 %vm231_vm1, %v2076_v6 }
  0xba   : > { %v932_v8 = vpop.permute.xlu0 %931  ;;  %v936_v9 = vpop.permute.xlu1 %935 }
  0xbb   : > { %v939_v12 = vsel %vm937_vm5, %v932_v8, %v934_v3  ;;  %v940_v13 = vsel %vm937_vm5, %v934_v3, %v936_v9  ;;  %v938_v14 = vsel %vm937_vm5, %v930_v7, %v932_v8 }
  0xbc   : > { %2104 = vmatpush.msk.msrb.mxu1 %vm244_vm0, %v939_v12  ;;  %2109 = vmatpush.msk.msrb.mxu2 %vm244_vm0, %v940_v13  ;;  %v1437_v38 = vpop.permute.xlu2 %1436 }
  0xbd   : > { %2067 = vmatmul.msk.f32.vlgmr.msra.gmra.mxu3 %vm231_vm1, %v2057_v58  ;;  %2072 = vmatmul.msk.f32.vlgmr.msra.gmra.mxu0 %vm231_vm1, %v2057_v58  ;;  %v1445_v39 = vsel %vm1444_vm8, %v1437_v38, %v1439_v33 }
  0xbe   : > { %2065 = vmatmul.msk.f32.gmra.mxu2 %vm231_vm1, %v2060_v10  ;;  %2082 = vmatmul.msk.f32.gmra.mxu1 %vm231_vm1, %v2077_v11 }
  0xbf   : > { %2099 = vmatpush.msk.msrb.mxu0 %vm244_vm0, %v938_v14  ;;  %v2614_v14 = vld [vmem:[%s2849_s1 + $0xf0] sm:$0xff] }
  0xc1   : > { %2123 = vmatpush.msk.msra.mxu0 %vm244_vm0, %v1108_v24 }
  0xc2   : > { %v1099_v18 = vpop.permute.xlu1 %1098  ;;  %v1268_v20 = vpop.permute.xlu0 %1267 }
  0xc3   : > { %v1107_v19 = vsel %vm1106_vm6, %v1099_v18, %v1101_v17 }
  0xc4   : > { %2118 = vmatpush.msk.msra.mxu3 %vm244_vm0, %v1107_v19  ;;  %v1612_v4 = vpop.permute.xlu2 %1611 }
  0xc5   : > { %2068 = vmatmul.msk.f32.gmra.mxu3 %vm231_vm1, %v2058_v63  ;;  %2073 = vmatmul.msk.f32.gmra.mxu0 %vm231_vm1, %v2058_v63 }
  0xc6   : > { %2083 = vmatmul.msk.f32.gmra.mxu1 %vm231_vm1, %v2078_v16  ;;  %2086 = vmatmul.msk.f32.vlgmr.msra.gmra.mxu2 %vm231_vm1, %v2076_v6 }
  0xca   : > { %v1270_v23 = vpop.permute.xlu1 %1269  ;;  %v1105_v26 = vpop.permute.xlu0 %1104 }
  0xcb   : > { %v1276_v25 = vsel %vm1275_vm7, %v1268_v20, %v1270_v23  ;;  %v1109_v27 = vsel %vm1106_vm6, %v1103_v22, %v1105_v26  ;;  %v2280_v20 = vmov 0  }
  0xcc   : > { %2137 = vmatpush.msk.msra.mxu2 %vm244_vm0, %v1276_v25  ;;  %2128 = vmatpush.msk.msra.mxu1 %vm244_vm0, %v1109_v27 }
  0xcd   : > { %2069 = vmatmul.msk.f32.gmra.mxu3 %vm231_vm1, %v2059_v5  ;;  %2074 = vmatmul.msk.f32.gmra.mxu0 %vm231_vm1, %v2059_v5  ;;  %v2136_v5 = vld [vmem:[%s2849_s1 + $0xd8] sm:$0xff] }
  0xce   : > { %2084 = vmatmul.msk.f32.gmra.mxu1 %vm231_vm1, %v2079_v21  ;;  %2087 = vmatmul.msk.f32.gmra.mxu2 %vm231_vm1, %v2077_v11 }
  0xcf   : > { %2234 = vset.pattern.permute.xlu0 %v2280_v20  ;;  %2235 = vset.pattern.permute.xlu1 %v2280_v20 }
  0xd0   : > { %2233 = vset.pattern.permute.xlu2 %v2280_v20 }
  0xd2   : > { %v1272_v29 = vpop.permute.xlu1 %1271  ;;  %v1441_v36 = vpop.permute.xlu0 %1440 }
  0xd3   : > { %v1277_v31 = vsel %vm1275_vm7, %v1270_v23, %v1272_v29  ;;  %v1446_v37 = vsel %vm1444_vm8, %v1439_v33, %v1441_v36  ;;  %v2632_v23 = vld [vmem:[%s2849_s1 + $0xf8] sm:$0xff] }
  0xd5   : > { %2070 = vmatmul.msk.f32.gmra.mxu3 %vm231_vm1, %v2060_v10  ;;  %2075 = vmatmul.msk.f32.gmra.mxu0 %vm231_vm1, %v2060_v10  ;;  %v2604_v10 = vpop.f32.mrf.mxu2 }
  0xd6   : > { %2088 = vmatmul.msk.f32.gmra.mxu2 %vm231_vm1, %v2078_v16  ;;  %2105 = vmatmul.msk.f32.vlgmr.msrb.gmra.mxu1 %vm231_vm1, %v2095_v28 }
  0xd7   : > { %2156 = vmatpush.msk.msrb.mxu1 %vm244_vm0, %v1445_v39 }
  0xda   : > { %v1274_v41 = vpop.permute.xlu1 %1273  ;;  %v1443_v44 = vpop.permute.xlu0 %1442 }
  0xdb   : > { %v1278_v42 = vsel %vm1275_vm7, %v1272_v29, %v1274_v41  ;;  %v1447_v47 = vsel %vm1444_vm8, %v1441_v36, %v1443_v44  ;;  %v1763_v29 = vld [vmem:[%s2850_s2 + $0x10] sm:$0xff]  ;;  %v1761_v41 = vld [vmem:[%s2850_s2] sm:$0xff]  ;;  %vm1885_vm7 = vcmask 1041408  }
  0xdc   : > { %1777 = vperm.xlu1 %2235, %v1763_v29   ;;  %1767 = vperm.xlu2 %2233, %v1761_v41  }
  0xdd   : > { %2091 = vmatmul.msk.f32.vlgmr.msrb.gmra.mxu3 %vm231_vm1, %v2076_v6  ;;  %2100 = vmatmul.msk.f32.vlgmr.msrb.gmra.mxu0 %vm231_vm1, %v2095_v28  ;;  %v2594_v6 = vld [vmem:[%s2849_s1 + $0xe8] sm:$0xff] }
  0xde   : > { %2089 = vmatmul.msk.f32.gmra.mxu2 %vm231_vm1, %v2079_v21  ;;  %2106 = vmatmul.msk.f32.gmra.mxu1 %vm231_vm1, %v2096_v30 }
  0xdf   : > { %2142 = vmatpush.msk.msrb.mxu3 %vm244_vm0, %v1277_v31  ;;  %2147 = vmatpush.msk.msrb.mxu0 %vm244_vm0, %v1278_v42  ;;  %v2171_v31 = vld [vmem:[%s2849_s1 + $0x100] sm:$0xff] }
  0xe2   : > { %v1610_v53 = vpop.permute.xlu1 %1609  ;;  %v1606_v8 = vpop.permute.xlu0 %1605 }
  0xe3   : > { %v1616_v7 = vsel %vm1613_vm9, %v1610_v53, %v1612_v4 }
  0xe5   : > { %2092 = vmatmul.msk.f32.gmra.mxu3 %vm231_vm1, %v2077_v11  ;;  %2101 = vmatmul.msk.f32.gmra.mxu0 %vm231_vm1, %v2096_v30 }
  0xe6   : > { %2107 = vmatmul.msk.f32.gmra.mxu1 %vm231_vm1, %v2097_v32  ;;  %2110 = vmatmul.msk.f32.vlgmr.msrb.gmra.mxu2 %vm231_vm1, %v2095_v28 }
  0xe7   : > { %2161 = vmatpush.msk.msrb.mxu2 %vm244_vm0, %v1446_v37 }
  0xea   : > { %v1608_v62 = vpop.permute.xlu1 %1607 }
  0xeb   : > { %v1615_v63 = vsel %vm1613_vm9, %v1608_v62, %v1610_v53  ;;  %v1614_v9 = vsel %vm1613_vm9, %v1606_v8, %v1608_v62 }
  0xed   : > { %2093 = vmatmul.msk.f32.gmra.mxu3 %vm231_vm1, %v2078_v16  ;;  %2102 = vmatmul.msk.f32.gmra.mxu0 %vm231_vm1, %v2097_v32 }
  0xee   : > { %2108 = vmatmul.msk.f32.gmra.mxu1 %vm231_vm1, %v2098_v34  ;;  %2111 = vmatmul.msk.f32.gmra.mxu2 %vm231_vm1, %v2096_v30 }
  0xf5   : > { %2094 = vmatmul.msk.f32.gmra.mxu3 %vm231_vm1, %v2079_v21  ;;  %2103 = vmatmul.msk.f32.gmra.mxu0 %vm231_vm1, %v2098_v34  ;;  %v1762_v21 = vld [vmem:[%s2850_s2 + $0x8] sm:$0xff] }
  0xf6   : > { %2112 = vmatmul.msk.f32.gmra.mxu2 %vm231_vm1, %v2097_v32  ;;  %2129 = vmatmul.msk.f32.vlgmr.msra.gmra.mxu1 %vm231_vm1, %v2114_v40 }
  0xf7   : > { %2180 = vmatpush.msk.msra.mxu1 %vm244_vm0, %v1615_v63  ;;  %1772 = vperm.xlu0 %2234, %v1762_v21  }
  0xfd   : > { %2119 = vmatmul.msk.f32.vlgmr.msra.gmra.mxu3 %vm231_vm1, %v2114_v40  ;;  %2124 = vmatmul.msk.f32.vlgmr.msra.gmra.mxu0 %vm231_vm1, %v2114_v40 }
  0xfe   : > { %2113 = vmatmul.msk.f32.gmra.mxu2 %vm231_vm1, %v2098_v34  ;;  %2130 = vmatmul.msk.f32.gmra.mxu1 %vm231_vm1, %v2115_v45 }
  0xff   : > { %2166 = vmatpush.msk.msra.mxu3 %vm244_vm0, %v1447_v47  ;;  %2175 = vmatpush.msk.msra.mxu0 %vm244_vm0, %v1614_v9 }
 0x103   : > { %v2561_v58 = vpop.f32.mrf.mxu1 }
 0x104   : > { %v541_v36 = vadd.f32 %v2561_v58, %v2565_v59  ;;  %v2173_v59 = vld [vmem:[%s2849_s1 + $0x110] sm:$0xff] }
 0x105   : > { %2120 = vmatmul.msk.f32.gmra.mxu3 %vm231_vm1, %v2115_v45  ;;  %2125 = vmatmul.msk.f32.gmra.mxu0 %vm231_vm1, %v2115_v45  ;;  %v2172_v45 = vld [vmem:[%s2849_s1 + $0x108] sm:$0xff] }
 0x106   : > { %2131 = vmatmul.msk.f32.gmra.mxu1 %vm231_vm1, %v2116_v49  ;;  %2138 = vmatmul.msk.f32.vlgmr.msra.gmra.mxu2 %vm231_vm1, %v2133_v50 }
 0x107   : > { %2185 = vmatpush.msk.msra.mxu2 %vm244_vm0, %v1616_v7  ;;  %v1764_v7 = vld [vmem:[%s2850_s2 + $0x18] sm:$0xff] }
 0x108   : > { %1782 = vperm.xlu2 %2233, %v1764_v7  }
 0x10b   : > { %v2583_v2 = vpop.f32.mrf.mxu1 }
 0x10d   : > { %2121 = vmatmul.msk.f32.gmra.mxu3 %vm231_vm1, %v2116_v49  ;;  %2126 = vmatmul.msk.f32.gmra.mxu0 %vm231_vm1, %v2116_v49  ;;  %v544_v49 = vadd.f32 %v2583_v2, %v2555_v56 }
 0x10e   : > { %2132 = vmatmul.msk.f32.gmra.mxu1 %vm231_vm1, %v2117_v54  ;;  %2139 = vmatmul.msk.f32.gmra.mxu2 %vm231_vm1, %v2134_v55 }
 0x113   : > { %v2607_v12 = vpop.f32.mrf.mxu1 }
 0x115   : > { %2122 = vmatmul.msk.f32.gmra.mxu3 %vm231_vm1, %v2117_v54  ;;  %2127 = vmatmul.msk.f32.gmra.mxu0 %vm231_vm1, %v2117_v54 }
 0x116   : > { %2140 = vmatmul.msk.f32.gmra.mxu2 %vm231_vm1, %v2135_v60  ;;  %2157 = vmatmul.msk.f32.vlgmr.msrb.gmra.mxu1 %vm231_vm1, %v2573_v61 }
 0x11a   : > { %v2586_v3 = vpop.f32.mrf.mxu0 }
 0x11b   : > { %v2627_v22 = vpop.f32.mrf.mxu1  ;;  %v540_v47 = vadd.f32 %v2586_v3, %v2547_v52 }
 0x11c   : > { %v550_v8 = vadd.f32 %v2627_v22, %v2604_v10 }
 0x11d   : > { %2143 = vmatmul.msk.f32.vlgmr.msrb.gmra.mxu3 %vm231_vm1, %v2133_v50  ;;  %2148 = vmatmul.msk.f32.vlgmr.msrb.gmra.mxu0 %vm231_vm1, %v2133_v50 }
 0x11e   : > { %2141 = vmatmul.msk.f32.gmra.mxu2 %vm231_vm1, %v2136_v5  ;;  %2158 = vmatmul.msk.f32.gmra.mxu1 %vm231_vm1, %v2594_v6 }
 0x120   : > { %v469_v11 = vpop.f32.mrf.mxu3 }
 0x121   : > { %v539_v15 = vadd.f32 %v469_v11, %v268_v46 }
 0x122   : > { %v2609_v13 = vpop.f32.mrf.mxu0 }
 0x123   : > { %v543_v52 = vadd.f32 %v2609_v13, %v2507_v35 }
 0x125   : > { %2144 = vmatmul.msk.f32.gmra.mxu3 %vm231_vm1, %v2134_v55  ;;  %2149 = vmatmul.msk.f32.gmra.mxu0 %vm231_vm1, %v2134_v55 }
 0x126   : > { %2159 = vmatmul.msk.f32.gmra.mxu1 %vm231_vm1, %v2614_v14  ;;  %2162 = vmatmul.msk.f32.vlgmr.msrb.gmra.mxu2 %vm231_vm1, %v2573_v61 }
 0x128   : > { %v472_v16 = vpop.f32.mrf.mxu3 }
 0x129   : > { %v638_v17 = vpop.f32.mrf.mxu2  ;;  %v542_v24 = vadd.f32 %v472_v16, %v2533_v48 }
 0x12a   : > { %v708_v18 = vadd.f32 %v638_v17, %v539_v15  ;;  %v2622_v19 = vpop.f32.mrf.mxu0 }
 0x12b   : > { %v546_v35 = vadd.f32 %v2622_v19, %v2522_v43 }
 0x12d   : > { %2145 = vmatmul.msk.f32.gmra.mxu3 %vm231_vm1, %v2135_v60  ;;  %2150 = vmatmul.msk.f32.gmra.mxu0 %vm231_vm1, %v2135_v60 }
 0x12e   : > { %2160 = vmatmul.msk.f32.gmra.mxu1 %vm231_vm1, %v2632_v23  ;;  %2163 = vmatmul.msk.f32.gmra.mxu2 %vm231_vm1, %v2594_v6 }
 0x130   : > { %v475_v25 = vpop.f32.mrf.mxu3 }
 0x131   : > { %v641_v26 = vpop.f32.mrf.mxu2  ;;  %v545_v33 = vadd.f32 %v475_v25, %v2557_v57 }
 0x132   : > { %v711_v27 = vadd.f32 %v641_v26, %v542_v24  ;;  %v2641_v28 = vpop.f32.mrf.mxu0 }
 0x133   : > { %v807_v30 = vpop.f32.mrf.mxu1  ;;  %v549_v43 = vadd.f32 %v2641_v28, %v2541_v51 }
 0x134   : > { %v2649_v32 = vadd.f32 %v807_v30, %v708_v18 }
 0x135   : > { %2146 = vmatmul.msk.f32.gmra.mxu3 %vm231_vm1, %v2136_v5  ;;  %2151 = vmatmul.msk.f32.gmra.mxu0 %vm231_vm1, %v2136_v5  ;;  %v2174_v5 = vld [vmem:[%s2849_s1 + $0x118] sm:$0xff] }
 0x136   : > { %2164 = vmatmul.msk.f32.gmra.mxu2 %vm231_vm1, %v2614_v14  ;;  %2181 = vmatmul.msk.f32.vlgmr.msra.gmra.mxu1 %vm231_vm1, %v2171_v31 }
 0x138   : > { %v478_v34 = vpop.f32.mrf.mxu3 }
 0x139   : > { %v644_v37 = vpop.f32.mrf.mxu2  ;;  %v548_v38 = vadd.f32 %v478_v34, %v277_v1 }
 0x13a   : > { %v714_v39 = vadd.f32 %v644_v37, %v545_v33  ;;  %v696_v40 = vpop.f32.mrf.mxu0 }
 0x13b   : > { %v810_v42 = vpop.f32.mrf.mxu1  ;;  %v2662_v44 = vadd.f32 %v696_v40, %v541_v36 }
 0x13c   : > { %v2667_v46 = vadd.f32 %v810_v42, %v711_v27 }
 0x13d   : > { %2167 = vmatmul.msk.f32.vlgmr.msra.gmra.mxu3 %vm231_vm1, %v2573_v61  ;;  %2176 = vmatmul.msk.f32.vlgmr.msra.gmra.mxu0 %vm231_vm1, %v2171_v31  ;;  %v547_v61 = vadd.f32 %v2607_v12, %v2578_v0 }
 0x13e   : > { %2165 = vmatmul.msk.f32.gmra.mxu2 %vm231_vm1, %v2632_v23  ;;  %2182 = vmatmul.msk.f32.gmra.mxu1 %vm231_vm1, %v2172_v45 }
 0x140   : > { %v667_v48 = vpop.f32.mrf.mxu3 }
 0x141   : > { %v647_v50 = vpop.f32.mrf.mxu2  ;;  %v709_v53 = vadd.f32 %v667_v48, %v540_v47 }
 0x142   : > { %v717_v54 = vadd.f32 %v647_v50, %v548_v38  ;;  %v699_v55 = vpop.f32.mrf.mxu0 }
 0x143   : > { %v713_v57 = vadd.f32 %v699_v55, %v544_v49  ;;  %v813_v58 = vpop.f32.mrf.mxu1 }
 0x144   : > { %v883_v60 = vadd.f32 %v813_v58, %v714_v39 }
 0x145   : > { %2168 = vmatmul.msk.f32.gmra.mxu3 %vm231_vm1, %v2594_v6  ;;  %2177 = vmatmul.msk.f32.gmra.mxu0 %vm231_vm1, %v2172_v45 }
 0x146   : > { %2183 = vmatmul.msk.f32.gmra.mxu1 %vm231_vm1, %v2173_v59  ;;  %2186 = vmatmul.msk.f32.vlgmr.msra.gmra.mxu2 %vm231_vm1, %v2171_v31 }
 0x148   : > { %v670_v56 = vpop.f32.mrf.mxu3 }
 0x149   : > { %v712_v62 = vadd.f32 %v670_v56, %v543_v52  ;;  %v836_v63 = vpop.f32.mrf.mxu2 }
 0x14a   : > { %v878_v1 = vadd.f32 %v836_v63, %v709_v53  ;;  %v702_v2 = vpop.f32.mrf.mxu0 }
 0x14b   : > { %v816_v3 = vpop.f32.mrf.mxu1  ;;  %v716_v4 = vadd.f32 %v702_v2, %v547_v61 }
 0x14c   : > { %v886_v6 = vadd.f32 %v816_v3, %v717_v54 }
 0x14d   : > { %2169 = vmatmul.msk.f32.gmra.mxu3 %vm231_vm1, %v2614_v14  ;;  %2178 = vmatmul.msk.f32.gmra.mxu0 %vm231_vm1, %v2173_v59 }
 0x14e   : > { %2184 = vmatmul.msk.f32.gmra.mxu1 %vm231_vm1, %v2174_v5  ;;  %2187 = vmatmul.msk.f32.gmra.mxu2 %vm231_vm1, %v2172_v45 }
 0x150   : > { %v673_v0 = vpop.f32.mrf.mxu3 }
 0x151   : > { %v715_v9 = vadd.f32 %v673_v0, %v546_v35  ;;  %v839_v11 = vpop.f32.mrf.mxu2 }
 0x152   : > { %v881_v12 = vadd.f32 %v839_v11, %v712_v62  ;;  %v705_v13 = vpop.f32.mrf.mxu0 }
 0x153   : > { %v1005_v14 = vpop.f32.mrf.mxu1  ;;  %v719_v15 = vadd.f32 %v705_v13, %v550_v8 }
 0x154   : > { %v2706_v16 = vadd.f32 %v1005_v14, %v878_v1 }
 0x155   : > { %2170 = vmatmul.msk.f32.gmra.mxu3 %vm231_vm1, %v2632_v23  ;;  %2179 = vmatmul.msk.f32.gmra.mxu0 %vm231_vm1, %v2174_v5 }
 0x156   : > { %2188 = vmatmul.msk.f32.gmra.mxu2 %vm231_vm1, %v2173_v59 }
 0x158   : > { %v676_v10 = vpop.f32.mrf.mxu3 }
 0x159   : > { %v718_v17 = vadd.f32 %v676_v10, %v549_v43  ;;  %v842_v18 = vpop.f32.mrf.mxu2 }
 0x15a   : > { %v884_v19 = vadd.f32 %v842_v18, %v715_v9  ;;  %v976_v20 = vpop.f32.mrf.mxu0 }
 0x15b   : > { %v1008_v21 = vpop.f32.mrf.mxu1  ;;  %v2715_v22 = vadd.f32 %v976_v20, %v2649_v32 }
 0x15c   : > { %v2717_v24 = vadd.f32 %v1008_v21, %v881_v12 }
 0x15e   : > { %2189 = vmatmul.msk.f32.gmra.mxu2 %vm231_vm1, %v2174_v5  ;;  %vm1883_vm1 = vcmask 1040384  }
 0x160   : > { %v865_v23 = vpop.f32.mrf.mxu3 }
 0x161   : > { %v845_v25 = vpop.f32.mrf.mxu2  ;;  %v879_v26 = vadd.f32 %v865_v23, %v2662_v44 }
 0x162   : > { %v887_v27 = vadd.f32 %v845_v25, %v718_v17  ;;  %v979_v29 = vpop.f32.mrf.mxu0 }
 0x163   : > { %v2722_v51 = vadd.f32 %v979_v29, %v2667_v46  ;;  %v1011_v28 = vpop.f32.mrf.mxu1  ;;  %v2764_v29 = vpop.permute.xlu2 %1767 }
 0x164   : > { %v2724_v30 = vadd.f32 %v1011_v28, %v884_v19 }
 0x168   : > { %v868_v31 = vpop.f32.mrf.mxu3 }
 0x169   : > { %v882_v33 = vadd.f32 %v868_v31, %v713_v57  ;;  %v1034_v32 = vpop.f32.mrf.mxu2 }
 0x16a   : > { %v1048_v34 = vadd.f32 %v1034_v32, %v879_v26  ;;  %v982_v36 = vpop.f32.mrf.mxu0 }
 0x16b   : > { %v2726_v37 = vadd.f32 %v982_v36, %v883_v60  ;;  %v1014_v38 = vpop.f32.mrf.mxu1 }
 0x16c   : > { %v2728_v39 = vadd.f32 %v1014_v38, %v887_v27 }
 0x170   : > { %v871_v40 = vpop.f32.mrf.mxu3 }
 0x171   : > { %v885_v41 = vadd.f32 %v871_v40, %v716_v4  ;;  %v1037_v42 = vpop.f32.mrf.mxu2 }
 0x172   : > { %v1051_v44 = vadd.f32 %v1037_v42, %v882_v33  ;;  %v985_v45 = vpop.f32.mrf.mxu0 }
 0x173   : > { %v1203_v46 = vpop.f32.mrf.mxu1  ;;  %v2730_v47 = vadd.f32 %v985_v45, %v886_v6 }
 0x174   : > { %v2732_v48 = vadd.f32 %v1203_v46, %v1048_v34 }
 0x178   : > { %v874_v49 = vpop.f32.mrf.mxu3 }
 0x179   : > { %v888_v50 = vadd.f32 %v874_v49, %v719_v15  ;;  %v1040_v53 = vpop.f32.mrf.mxu2  ;;  %v2775_v49 = vpop.permute.xlu0 %1772 }
 0x17a   : > { %v1054_v54 = vadd.f32 %v1040_v53, %v885_v41  ;;  %v1174_v55 = vpop.f32.mrf.mxu0 }
 0x17b   : > { %v1206_v57 = vpop.f32.mrf.mxu1  ;;  %v1216_v19 = vadd.f32 %v1174_v55, %v2706_v16 }
 0x17c   : > { %v2734_v58 = vadd.f32 %v1206_v57, %v1051_v44 }
 0x180   : > { %v1145_v59 = vpop.f32.mrf.mxu3 }
 0x181   : > { %v1043_v60 = vpop.f32.mrf.mxu2  ;;  %v1215_v31 = vadd.f32 %v1145_v59, %v2715_v22 }
 0x182   : > { %v1057_v52 = vadd.f32 %v1043_v60, %v888_v50  ;;  %v1177_v56 = vpop.f32.mrf.mxu0 }
 0x183   : > { %v1209_v61 = vpop.f32.mrf.mxu1  ;;  %v1219_v16 = vadd.f32 %v1177_v56, %v2717_v24 }
 0x184   : > { %v2736_v62 = vadd.f32 %v1209_v61, %v1054_v54 }
 0x188   : > { %v1148_v63 = vpop.f32.mrf.mxu3 }
 0x189   : > { %v1314_v1 = vpop.f32.mrf.mxu2  ;;  %v1218_v53 = vadd.f32 %v1148_v63, %v2722_v51 }
 0x18a   : > { %v1180_v2 = vpop.f32.mrf.mxu0  ;;  %v1384_v32 = vadd.f32 %v1314_v1, %v1215_v31 }
 0x18b   : > { %v1212_v3 = vpop.f32.mrf.mxu1  ;;  %v1222_v55 = vadd.f32 %v1180_v2, %v2724_v30  ;;  %v2783_v30 = vpop.permute.xlu1 %1777 }
 0x18c   : > { %v2738_v4 = vadd.f32 %v1212_v3, %v1057_v52 }
 0x190   : > { %v2740_v5 = vpop.f32.mrf.mxu3 }
 0x191   : > { %v1317_v6 = vpop.f32.mrf.mxu2 }
 0x192   : > { %v2742_v35 = vpop.f32.mrf.mxu0  ;;  %v1387_v60 = vadd.f32 %v1317_v6, %v1218_v53  ;;  %v1221_v6 = vadd.f32 %v2740_v5, %v2726_v37 }
 0x193   : > { %v1483_v0 = vpop.f32.mrf.mxu1 }
 0x194   : > { %v1553_v40 = vadd.f32 %v1483_v0, %v1384_v32 }
 0x198   : > { %v2744_v7 = vpop.f32.mrf.mxu3 }
 0x199   : > { %v2746_v8 = vpop.f32.mrf.mxu2 }
 0x19a   : > { %v2748_v9 = vpop.f32.mrf.mxu0 }
 0x19b   : > { %v1486_v11 = vpop.f32.mrf.mxu1 }
 0x19c   : > { %v1556_v1 = vadd.f32 %v1486_v11, %v1387_v60  ;;  %v1225_v11 = vadd.f32 %v2742_v35, %v2728_v39 }
 0x1a0   : > { %v1343_v12 = vpop.f32.mrf.mxu3 }
 0x1a1   : > { %v2750_v13 = vpop.f32.mrf.mxu2  ;;  %v1385_v20 = vadd.f32 %v1343_v12, %v1216_v19 }
 0x1a2   : > { %v2752_v14 = vpop.f32.mrf.mxu0 }
 0x1a3   : > { %v2754_v15 = vpop.f32.mrf.mxu1 }
 0x1a8   : > { %v1346_v43 = vpop.f32.mrf.mxu3 }
 0x1a9   : > { %v1512_v10 = vpop.f32.mrf.mxu2  ;;  %v1388_v34 = vadd.f32 %v1346_v43, %v1219_v16 }
 0x1aa   : > { %v2756_v17 = vpop.f32.mrf.mxu0  ;;  %v1554_v25 = vadd.f32 %v1512_v10, %v1385_v20 }
 0x1ab   : > { %v2758_v18 = vpop.f32.mrf.mxu1 }
 0x1b0   : > { %v1349_v21 = vpop.f32.mrf.mxu3 }
 0x1b1   : > { %v1515_v23 = vpop.f32.mrf.mxu2  ;;  %v1391_v56 = vadd.f32 %v1349_v21, %v1222_v55 }
 0x1b2   : > { %v2762_v26 = vpop.f32.mrf.mxu0  ;;  %v1557_v42 = vadd.f32 %v1515_v23, %v1388_v34  ;;  %v1386_v23 = vadd.f32 %v2748_v9, %v2732_v48 }
 0x1b3   : > { %v1681_v27 = vpop.f32.mrf.mxu1 }
 0x1b4   : > { %v1723_v28 = vadd.f32 %v1681_v27, %v1554_v25  ;;  %v1390_v27 = vadd.f32 %v2746_v8, %v1221_v6 }
 0x1b6   : > { %v1786_v33 = vadd.f32 %v2764_v29, %v1723_v28  ;;  %v1559_v37 = vadd.f32 %v2754_v15, %v1390_v27 }
 0x1b8   : > { %v1801_v36 = vrot.slane %v1786_v33, 1  ;;  %1867 = vst [vmem:[%s2770_s19 + $0x8] sm:$0xff] %v1786_v33  ;;  %v1352_v38 = vpop.f32.mrf.mxu3 }
 0x1b9   : > { %v1518_v41 = vpop.f32.mrf.mxu2  ;;  %v1394_v31 = vadd.f32 %v1352_v38, %v1225_v11  ;;  %v1224_v38 = vadd.f32 %v2744_v7, %v2730_v47 }
 0x1ba   : > { %v1807_v22 = vsub.f32 %v1786_v33, %v1801_v36  ;;  %v1652_v44 = vpop.f32.mrf.mxu0  ;;  %v1560_v12 = vadd.f32 %v1518_v41, %v1391_v56  ;;  %v1389_v41 = vadd.f32 %v2752_v14, %v2734_v58 }
 0x1bb   : > { %v1722_v45 = vadd.f32 %v1652_v44, %v1553_v40  ;;  %v1684_v46 = vpop.f32.mrf.mxu1  ;;  %v2801_v40 = vpop.permute.xlu2 %1782 }
 0x1bc   : > { %v1810_v50 = vsub.f32 0.0, %v1807_v22  ;;  %v1726_v24 = vadd.f32 %v1684_v46, %v1557_v42 }
 0x1bd   : > { %v1785_v54 = vadd.f32 %v2764_v29, %v1722_v45  ;;  %v1393_v45 = vadd.f32 %v2750_v13, %v1224_v38 }
 0x1be   : > { %v1814_v57 = vmul.f32 1.442695, %v1810_v50  ;;  %v1789_v59 = vadd.f32 %v2775_v49, %v1726_v24 }
 0x1bf   : > { %v1800_v52 = vrot.slane %v1785_v54, 1  ;;  %1866 = vst [vmem:[%s2770_s19] sm:$0xff] %v1785_v54  ;;  %v1562_v7 = vadd.f32 %v2758_v18, %v1393_v45 }
 0x1c0   : > { %2236 = vpow2.f32 %v1814_v57  ;;  %1870 = vst [vmem:[%s2770_s19 + $0x20] sm:$0xff] %v1789_v59  ;;  %v1541_v61 = vpop.f32.mrf.mxu3 }
 0x1c1   : > { %v1806_v3 = vsub.f32 %v1785_v54, %v1800_v52  ;;  %v1521_v0 = vpop.f32.mrf.mxu2  ;;  %v1555_v16 = vadd.f32 %v1541_v61, %v1386_v23 }
 0x1c2   : > { %v1655_v43 = vpop.f32.mrf.mxu0  ;;  %v1563_v39 = vadd.f32 %v1521_v0, %v1394_v31 }
 0x1c3   : > { %v1809_v51 = vsub.f32 0.0, %v1806_v3  ;;  %v1725_v63 = vadd.f32 %v1655_v43, %v1556_v1  ;;  %v1687_v10 = vpop.f32.mrf.mxu1  ;;  %v1392_v1 = vadd.f32 %v2756_v17, %v2736_v62 }
 0x1c4   : > { %v1729_v2 = vadd.f32 %v1687_v10, %v1560_v12 }
 0x1c5   : > { %v1812_v19 = vmul.f32 1.442695, %v1809_v51  ;;  %v1788_v20 = vadd.f32 %v2775_v49, %v1725_v63 }
 0x1c6   : > { %v2237_v21 = vpop.eup %2236  ;;  %v1792_v25 = vadd.f32 %v2783_v30, %v1729_v2 }
 0x1c7   : > { %v1819_v28 = vadd.f32 1.0, %v2237_v21  ;;  %2238 = vpow2.f32 %v1812_v19  ;;  %1869 = vst [vmem:[%s2770_s19 + $0x18] sm:$0xff] %v1788_v20 }
 0x1c8   : > { %1873 = vst [vmem:[%s2770_s19 + $0x38] sm:$0xff] %v1792_v25  ;;  %v1544_v5 = vpop.f32.mrf.mxu3  ;;  %v1395_v25 = vadd.f32 %v2762_v26, %v2738_v4 }
 0x1c9   : > { %2240 = vrcp.f32 %v1819_v28  ;;  %v1710_v33 = vpop.f32.mrf.mxu2  ;;  %v1558_v47 = vadd.f32 %v1544_v5, %v1389_v41  ;;  %v1847_v54 = vand.u32 2147483648, %v1819_v28  ;;  %v1845_v60 = vand.u32 2147483647, %v1819_v28 }
 0x1ca   : > { %v1724_v35 = vadd.f32 %v1710_v33, %v1555_v16  ;;  %v1658_v32 = vpop.f32.mrf.mxu0  ;;  %vm1841_vm11 = vweird.f32 %v1819_v28  ;;  %v1888_v41 = vlaneseq }
 0x1cb   : > { %v1728_v48 = vadd.f32 %v1658_v32, %v1559_v37  ;;  %v1690_v9 = vpop.f32.mrf.mxu1  ;;  %v1848_v0 = vor.u32 1.1754944e-38, %v1847_v54  ;;  %vm1846_vm13 = vcmp.eq.f32.partialorder %v1845_v60, 8.507059e+37 }
 0x1cc   : > { %v1787_v8 = vadd.f32 %v2764_v29, %v1724_v35  ;;  %v1732_v34 = vadd.f32 %v1690_v9, %v1563_v39  ;;  %vm1890_vm8 = vcmp.lt.s32.totalorder %v1888_v41, 384 }
 0x1cd   : > { %v2239_v36 = vpop.eup %2238  ;;  %v1791_v15 = vadd.f32 %v2783_v30, %v1728_v48 }
 0x1ce   : > { %v2805_v42 = vadd.f32 1.0, %v2239_v36  ;;  %v1802_v22 = vrot.slane %v1787_v8, 1  ;;  %1868 = vst [vmem:[%s2770_s19 + $0x10] sm:$0xff] %v1787_v8  ;;  %v1795_v44 = vadd.f32 %v2801_v40, %v1732_v34 }
 0x1cf   : > { %v2241_v29 = vpop.eup %2240  ;;  %1872 = vst [vmem:[%s2770_s19 + $0x30] sm:$0xff] %v1791_v15 }
 0x1d0   : > { %v1837_v46 = vmul.f32 %v2241_v29, %v1819_v28  ;;  %2242 = vrcp.f32 %v2805_v42  ;;  %1876 = vst [vmem:[%s2770_s19 + $0x50] sm:$0xff] %v1795_v44  ;;  %v1808_v50 = vsub.f32 %v1787_v8, %v1802_v22  ;;  %v1547_v57 = vpop.f32.mrf.mxu3  ;;  %vm1842_vm10 = vweird.f32 %v2241_v29 }
 0x1d1   : > { %v1713_v24 = vpop.f32.mrf.mxu2  ;;  %vm1843_vm12 = vmor %vm1841_vm11, %vm1842_vm10  ;;  %v1561_v51 = vadd.f32 %v1547_v57, %v1392_v1  ;;  %v1832_v62 = vand.u32 2147483648, %v2805_v42  ;;  %v1830_v6 = vand.u32 2147483647, %v2805_v42  ;;  %vm1826_vm15 = vweird.f32 %v2805_v42 }
 0x1d2   : > { %v1838_v58 = vsub.f32 1.0, %v1837_v46  ;;  %v1727_v14 = vadd.f32 %v1713_v24, %v1558_v47  ;;  %v1661_v53 = vpop.f32.mrf.mxu0  ;;  %v1811_v55 = vsub.f32 0.0, %v1808_v50 }
 0x1d3   : > { %v1731_v59 = vadd.f32 %v1661_v53, %v1562_v7  ;;  %v1833_v27 = vor.u32 1.1754944e-38, %v1832_v62  ;;  %vm1831_vm2 = vcmp.eq.f32.partialorder %v1830_v6, 8.507059e+37 }
 0x1d4   : > { %v1839_v13 = vmul.f32 %v2241_v29, %v1838_v58  ;;  %v1790_v52 = vadd.f32 %v2775_v49, %v1727_v14  ;;  %v1816_v56 = vmul.f32 1.442695, %v1811_v55 }
 0x1d5   : > { %v1794_v61 = vadd.f32 %v2801_v40, %v1731_v59 }
 0x1d6   : > { %v2243_v18 = vpop.eup %2242  ;;  %v1840_v3 = vadd.f32 %v2241_v29, %v1839_v13  ;;  %1871 = vst [vmem:[%s2770_s19 + $0x28] sm:$0xff] %v1790_v52  ;;  %2244 = vpow2.f32 %v1816_v56 }
 0x1d7   : > { %v1822_v12 = vmul.f32 %v2243_v18, %v2805_v42  ;;  %1875 = vst [vmem:[%s2770_s19 + $0x48] sm:$0xff] %v1794_v61  ;;  %vm1827_vm14 = vweird.f32 %v2243_v18 }
 0x1d8   : > { %v1844_v43 = vsel %vm1843_vm12, %v2241_v29, %v1840_v3  ;;  %v1550_v23 = vpop.f32.mrf.mxu3  ;;  %vm1828_vm0 = vmor %vm1826_vm15, %vm1827_vm14 }
 0x1d9   : > { %v2821_v49 = vsel %vm1846_vm13, %v1848_v0, %v1844_v43  ;;  %v1823_v63 = vsub.f32 1.0, %v1822_v12  ;;  %v1716_v10 = vpop.f32.mrf.mxu2  ;;  %v1564_v37 = vadd.f32 %v1550_v23, %v1395_v25 }
 0x1da   : > { %1909 = vst [vmem:[#allocation1 + $0x9] sm:$0xff] %v2821_v49  ;;  %v1730_v17 = vadd.f32 %v1716_v10, %v1561_v51  ;;  %v1895_v21 = vsub.f32 1.0, %v2821_v49  ;;  %v1881_v31 = vrot.slane %v2821_v49, 7 }
 0x1db   : > { %v1824_v2 = vmul.f32 %v2243_v18, %v1823_v63 }
 0x1dc   : > { %v1793_v19 = vadd.f32 %v2783_v30, %v1730_v17  ;;  %v2245_v20 = vpop.eup %2244  ;;  %v1900_v5 = vrot.slane %v1895_v21, 7 }
 0x1dd   : > { %v1825_v11 = vadd.f32 %v2243_v18, %v1824_v2  ;;  %v1820_v28 = vadd.f32 1.0, %v2245_v20 }
 0x1de   : > { %1874 = vst [vmem:[%s2770_s19 + $0x40] sm:$0xff] %v1793_v19 }
 0x1df   : > { %v1829_v16 = vsel %vm1828_vm0, %v2243_v18, %v1825_v11  ;;  %2246 = vrcp.f32 %v1820_v28  ;;  %v1862_v34 = vand.u32 2147483648, %v1820_v28  ;;  %v1860_v38 = vand.u32 2147483647, %v1820_v28 }
 0x1e0   : > { %v1834_v30 = vsel %vm1831_vm2, %v1833_v27, %v1829_v16  ;;  %vm1856_vm4 = vweird.f32 %v1820_v28 }
 0x1e1   : > { %v1894_v33 = vsub.f32 1.0, %v1834_v30  ;;  %1908 = vst [vmem:[#allocation1] sm:$0xff] %v1834_v30  ;;  %v1884_v39 = vsel %vm1883_vm1, %v1834_v30, %v1881_v31  ;;  %v1719_v35 = vpop.f32.mrf.mxu2  ;;  %v1863_v42 = vor.u32 1.1754944e-38, %v1862_v34  ;;  %vm1861_vm6 = vcmp.eq.f32.partialorder %v1860_v38, 8.507059e+37 }
 0x1e2   : > { %v1733_v32 = vadd.f32 %v1719_v35, %v1564_v37 }
 0x1e3   : > { %v1902_v4 = vsel %vm1883_vm1, %v1894_v33, %v1900_v5 }
 0x1e4   : > { %v1796_v26 = vadd.f32 %v2801_v40, %v1733_v32 }
 0x1e5   : > { %v2247_v48 = vpop.eup %2246 }
 0x1e6   : > { %1877 = vst [vmem:[%s2770_s19 + $0x58] sm:$0xff] %v1796_v26  ;;  %v1852_v9 = vmul.f32 %v2247_v48, %v1820_v28  ;;  %vm1857_vm3 = vweird.f32 %v2247_v48 }
 0x1e7   : > { %vm1858_vm5 = vmor %vm1856_vm4, %vm1857_vm3 }
 0x1e8   : > { %v1853_v8 = vsub.f32 1.0, %v1852_v9 }
 0x1ea   : > { %v1854_v36 = vmul.f32 %v2247_v48, %v1853_v8 }
 0x1ec   : > { %v1855_v15 = vadd.f32 %v2247_v48, %v1854_v36 }
 0x1ee   : > { %v1859_v22 = vsel %vm1858_vm5, %v2247_v48, %v1855_v15 }
 0x1ef   : > { %v1864_v44 = vsel %vm1861_vm6, %v1863_v42, %v1859_v22 }
 0x1f0   : > { %v1882_v40 = vrot.slane %v1864_v44, 6  ;;  %v1896_v29 = vsub.f32 1.0, %v1864_v44  ;;  %1910 = vst [vmem:[#allocation1 + $0x12] sm:$0xff] %v1864_v44 }
 0x1f2   : > { %v1886_v45 = vsel %vm1885_vm7, %v1884_v39, %v1882_v40  ;;  %v1901_v46 = vrot.slane %v1896_v29, 6 }
 0x1f3   : > { %1892 = vst.msk [vmem:[%s2770_s19] ss:$8 sm:$0x7] %vm1890_vm8, %v1886_v45 }
 0x1f4   : > { %v1903_v47 = vsel %vm1885_vm7, %v1902_v4, %v1901_v46 }
 0x1f5   : > { %2190 = vst.msk [vmem:[%s2770_s19 + $0x1] ss:$8 sm:$0x7] %vm1890_vm8, %v1903_v47 }
 0x1f7   : > { %v1912_v7 = vld [vmem:[#allocation1 + $0x2] ss:$9 sm:$0xff] }
 0x1f8   : > { %2191 = vst.msk [vmem:[%s2770_s19 + $0x2] ss:$8 sm:$0x7] %vm1890_vm8, %v1912_v7 }
 0x1f9   : > { %1917 = vst [vmem:[#allocation1] sm:$0xff] %v1894_v33 }
 0x1fa   : > { %1918 = vst [vmem:[#allocation1 + $0x9] sm:$0xff] %v1895_v21 }
 0x1fb   : > { %1919 = vst [vmem:[#allocation1 + $0x12] sm:$0xff] %v1896_v29 }
 0x202   : > { %v1921_v50 = vld [vmem:[#allocation1 + $0x2] ss:$9 sm:$0xff] }
 0x203   : > { %2192 = vst.msk [vmem:[%s2770_s19 + $0x3] ss:$8 sm:$0x7] %vm1890_vm8, %v1921_v50 }
 0x204 PF: > { %s13_s14 = sadd.s32 1, %s2270_s14   ;;  %s2852_s12 = smov %s2266_s13 }
 0x205   : > { %p10_p5 = scmp.ge.s32.totalorder %s13_s14, 4   ;;  %s2853_s13 = smov %s2855_s15 }
 0x207   :  { %12 = sbr.rel (!%p10_p5) target bundleno = 2 (0x2), region = 99 }

</bundles_post_ra>
